<compile_context>
chip_gen: v7x
topology: tpu7x:2x2x1
jax: 0.10.0
libtpu: 0.0.40
codegen_flags: <defaults>
</compile_context>

<pallas_src>
import functools

import jax
import jax.numpy as jnp
import numpy as np
from jax.experimental import pallas as pl
from jax.experimental.pallas import tpu as pltpu


# ----------------------------- Pallas kernel --------------------------------
def _decoder_kernel(*refs, n_seq, dim, heads, tb, has_mask):
    bf16, f32 = jnp.bfloat16, jnp.float32
    hd = dim // heads

    if has_mask:
        (x_ref, bias_ref,
         ln1_ref, wqkv_ref, bqkv_ref, wo_ref, bo_ref,
         ln2_ref, wf1_ref, bf1_ref, wf2_ref, bf2_ref,
         wlg_ref, blg_ref,
         out_ref, ctx_ref) = refs
    else:
        (x_ref,
         ln1_ref, wqkv_ref, bqkv_ref, wo_ref, bo_ref,
         ln2_ref, wf1_ref, bf1_ref, wf2_ref, bf2_ref,
         wlg_ref, blg_ref,
         out_ref, ctx_ref) = refs
        bias_ref = None

    m_rows = tb * n_seq
    x = x_ref[...].reshape(m_rows, dim)        # N % 8 == 0 -> free reshape

    def layer_norm(v, gb_ref):
        gb = gb_ref[...]                       # (2, D): row 0 = gamma, 1 = beta
        mu = jnp.mean(v, axis=-1, keepdims=True)
        var = jnp.mean((v - mu) * (v - mu), axis=-1, keepdims=True)
        return (v - mu) * jax.lax.rsqrt(var + 1e-5) * gb[0:1, :] + gb[1:2, :]

    # ---- pre-LN multi-head self-attention (batch-fused QKV projection) ----
    h = layer_norm(x, ln1_ref)
    qkv = jnp.dot(h.astype(bf16), wqkv_ref[...],
                  preferred_element_type=f32) + bqkv_ref[0:1, :]   # (M, 3*D)

    for b in range(tb):                        # static unroll; aligned slices
        r0 = b * n_seq
        qkv_b = qkv[r0:r0 + n_seq, :].astype(bf16)    # one bulk cast per batch
        for hh in range(heads):
            c = hh * hd
            qh = qkv_b[:, c:c + hd]                   # (N, hd), scale folded in
            kh = qkv_b[:, dim + c:dim + c + hd]
            vh = qkv_b[:, 2 * dim + c:2 * dim + c + hd]
            s = jax.lax.dot_general(                  # NT dot, no transpose
                qh, kh, (((1,), (1,)), ((), ())),
                preferred_element_type=f32)           # (N, N)
            if has_mask:
                s = s + bias_ref[b]                   # (1, N) row broadcast
            s = s - jnp.max(s, axis=-1, keepdims=True)
            p = jnp.exp(s)
            p = p * pl.reciprocal(jnp.sum(p, axis=-1, keepdims=True),
                                  approx=True)
            ctx_h = jnp.dot(p.astype(bf16), vh,
                            preferred_element_type=f32)           # (N, hd)
            ctx_ref[r0:r0 + n_seq, c:c + hd] = ctx_h  # assemble ctx slab

    # single (M, D) x (D, D) out-projection for all heads / batches
    attn = jnp.dot(ctx_ref[...].astype(bf16), wo_ref[...],
                   preferred_element_type=f32)
    h1 = x + attn + bo_ref[0:1, :]

    # ---- pre-LN MLP (GELU) + residual ----
    g = layer_norm(h1, ln2_ref)
    ff = jnp.dot(g.astype(bf16), wf1_ref[...],
                 preferred_element_type=f32) + bf1_ref[0:1, :]
    # TODO(synk): PyTorch nn.GELU defaults to the exact erf form; the tanh
    # approximation is used here (and in the reference) for TPU friendliness.
    ff = jax.nn.gelu(ff)
    ff = jnp.dot(ff.astype(bf16), wf2_ref[...],
                 preferred_element_type=f32) + bf2_ref[0:1, :]
    h2 = h1 + ff

    # ---- to_logit: nn.Linear(dim, logit_dim), lane-dense (padded to 128) ----
    logits = jnp.dot(h2.astype(bf16), wlg_ref[...],
                     preferred_element_type=f32) + blg_ref[0:1, :]
    out_ref[...] = logits.reshape(tb, n_seq, logits.shape[-1])


# ------------------------------- wrapper -------------------------------------
def motion_decoder_positional(x, params, mask=None, *, heads=4):
    """x: (B, N, D) float32; mask: optional (B, N) bool (True = attend)."""
    B, N, D = x.shape
    L = params["w_logit"].shape[1]
    F = params["w_ff1"].shape[1]
    hd = D // heads
    LP = ((max(L, 1) + 127) // 128) * 128
    f32, bf16 = jnp.float32, jnp.bfloat16
    has_mask = mask is not None

    # ---- per-generation tiling: fused M-rows sized to the MXU, and the
    #      ">= 2 grid steps" split only on 2-TensorCore parts (v7x) ----
    try:
        kind = jax.devices()[0].device_kind.lower()
    except Exception:  # pragma: no cover
        kind = ""
    if "v5" in kind:
        mxu_m, two_tc = 128, False
    elif "v6" in kind:
        mxu_m, two_tc = 256, False
    else:
        mxu_m, two_tc = 256, ("v7" in kind)

    tb = max(1, min(B, max(1, mxu_m // N)))
    if two_tc and tb >= B and B > 1:
        tb = (B + 1) // 2
    steps = -(-B // tb)
    Bp = steps * tb

    xp = x.astype(f32)
    if Bp != B:
        xp = jnp.pad(xp, ((0, Bp - B), (0, 0), (0, 0)))

    inputs = [xp]
    in_specs = [pl.BlockSpec((tb, N, D), lambda i: (i, 0, 0))]
    bias = None
    if has_mask:
        bias = jnp.where(mask[:, None, :], 0.0, -1e9).astype(f32)
        if Bp != B:
            bias = jnp.pad(bias, ((0, Bp - B), (0, 0), (0, 0)))
        inputs.append(bias)
        in_specs.append(pl.BlockSpec((tb, 1, N), lambda i: (i, 0, 0)))

    # ---- host-side weight prep (one-time / amortizable): softmax scale folded
    #      into Wq AND bq, bf16 matmul operands, lane-padded to_logit ----
    scale = 1.0 / float(np.sqrt(hd))
    wq, wk, wv = jnp.split(params["w_qkv"], 3, axis=1)
    bq, bk, bv = jnp.split(params["b_qkv"], 3, axis=1)
    w_qkv = jnp.concatenate([wq * scale, wk, wv], axis=1).astype(bf16)  # (D,3D)
    b_qkv = jnp.concatenate([bq * scale, bk, bv], axis=1).astype(f32)   # (1,3D)
    w_logit_p = jnp.pad(params["w_logit"], ((0, 0), (0, LP - L))).astype(bf16)
    b_logit_p = jnp.pad(params["b_logit"], ((0, 0), (0, LP - L))).astype(f32)

    weights = [
        params["ln1"].astype(f32),                 # (2, D)
        w_qkv, b_qkv,
        params["w_out"].astype(bf16), params["b_out"].astype(f32),
        params["ln2"].astype(f32),
        params["w_ff1"].astype(bf16), params["b_ff1"].astype(f32),
        params["w_ff2"].astype(bf16), params["b_ff2"].astype(f32),
        w_logit_p, b_logit_p,
    ]

    def full_spec(arr):
        # Grid-invariant weights: same full block every step (resident).
        # TODO(synk): single-buffer these via pipeline_mode=pl.Buffered(1)
        # once the installed JAX version supports it for invariant inputs.
        nd = arr.ndim
        return pl.BlockSpec(arr.shape, lambda i, _n=nd: (0,) * _n)

    in_specs += [full_spec(w) for w in weights]
    inputs += weights

    # ---- advisory cost estimate (real, unpadded shapes) ----
    M = Bp * N
    flops = int(2 * M * D * (3 * D)                 # QKV projection
                + Bp * heads * 4 * N * N * hd       # QK^T + PV
                + 2 * M * D * D                     # out-projection
                + 2 * M * (D * F + F * D)           # MLP
                + 2 * M * D * LP)                   # to_logit
    transcendentals = int(Bp * heads * N * N + M * F)
    weight_bytes = sum(int(w.size) * w.dtype.itemsize for w in weights)
    bytes_accessed = int(xp.size * 4 + Bp * N * LP * 4 + weight_bytes
                         + (int(bias.size) * 4 if has_mask else 0))

    # ---- VMEM budget: double-buffered streamed blocks + resident weights ----
    block_bytes = 2 * (tb * N * D * 4 + tb * N * LP * 4)
    if has_mask:
        block_bytes += 2 * tb * N * 4
    footprint = block_bytes + 2 * weight_bytes + tb * N * D * 4
    vmem_limit = int(min(64 * 1024 * 1024, max(3 * footprint, 16 * 1024 * 1024)))

    kernel = functools.partial(_decoder_kernel, n_seq=N, dim=D, heads=heads,
                               tb=tb, has_mask=has_mask)

    out = pl.pallas_call(
        kernel,
        out_shape=jax.ShapeDtypeStruct((Bp, N, LP), f32),
        grid_spec=pltpu.PrefetchScalarGridSpec(
            num_scalar_prefetch=0,
            grid=(steps,),
            in_specs=in_specs,
            out_specs=pl.BlockSpec((tb, N, LP), lambda i: (i, 0, 0)),
            scratch_shapes=[pltpu.VMEM((tb * N, D), jnp.float32)],  # ctx slab
        ),
        compiler_params=pltpu.CompilerParams(
            dimension_semantics=("parallel",),
            vmem_limit_bytes=vmem_limit),
        cost_estimate=pl.CostEstimate(flops=flops,
                                      transcendentals=transcendentals,
                                      bytes_accessed=bytes_accessed),
    )(*inputs)
    return out[:B, :, :L]


# --------------------------- pure-JAX reference ------------------------------
def _reference(x, params, mask=None, *, heads=4):
    B, N, D = x.shape
    hd = D // heads
    scale = 1.0 / float(np.sqrt(hd))
    bias = (jnp.zeros((B, 1, N)) if mask is None
            else jnp.where(mask[:, None, :], 0.0, -1e9))

    def ln(v, gb):
        mu = v.mean(-1, keepdims=True)
        var = ((v - mu) ** 2).mean(-1, keepdims=True)
        return (v - mu) * jax.lax.rsqrt(var + 1e-5) * gb[0] + gb[1]

    h = ln(x, params["ln1"])
    qkv = h @ params["w_qkv"] + params["b_qkv"][0]
    q, k, v = jnp.split(qkv, 3, axis=-1)
    q = q.reshape(B, N, heads, hd)
    k = k.reshape(B, N, heads, hd)
    v = v.reshape(B, N, heads, hd)
    s = jnp.einsum("bnhd,bmhd->bhnm", q, k) * scale + bias[:, None, :, :]
    p = jax.nn.softmax(s, axis=-1)
    attn = jnp.einsum("bhnm,bmhd->bnhd", p, v).reshape(B, N, D)
    h1 = x + attn @ params["w_out"] + params["b_out"][0]
    g = ln(h1, params["ln2"])
    ff = jax.nn.gelu(g @ params["w_ff1"] + params["b_ff1"][0])
    h2 = h1 + ff @ params["w_ff2"] + params["b_ff2"][0]
    return h2 @ params["w_logit"] + params["b_logit"][0]


# -------------------------------- main ---------------------------------------
if __name__ == "__main__":
    B, N, D, L, F, H = 4, 8, 32, 64, 64, 4   # batch, seq, dim, logit_dim, ffn, heads

    key = jax.random.PRNGKey(0)
    ks = jax.random.split(key, 10)

    def init(k, shape, scl=0.02):
        return (scl * jax.random.normal(k, shape)).astype(jnp.float32)

    params = {
        "ln1":     jnp.stack([jnp.ones((D,)), jnp.zeros((D,))]).astype(jnp.float32),
        "w_qkv":   init(ks[0], (D, 3 * D)),
        "b_qkv":   jnp.zeros((1, 3 * D), jnp.float32),
        "w_out":   init(ks[1], (D, D)),
        "b_out":   jnp.zeros((1, D), jnp.float32),
        "ln2":     jnp.stack([jnp.ones((D,)), jnp.zeros((D,))]).astype(jnp.float32),
        "w_ff1":   init(ks[2], (D, F)),
        "b_ff1":   init(ks[3], (1, F)),
        "w_ff2":   init(ks[4], (F, D)),
        "b_ff2":   init(ks[5], (1, D)),
        "w_logit": init(ks[6], (D, L)),
        "b_logit": init(ks[7], (1, L)),
    }

    x = jax.random.normal(ks[8], (B, N, D), dtype=jnp.float32)

    # TODO(synk): the original `attn_layers` is injected externally (e.g. an
    # x-transformers Encoder); a depth-1 pre-LN attention+MLP block is used
    # here as its deterministic synthetic realization.
    logits = motion_decoder_positional(x, params, mask=None, heads=H)
    logits = jax.block_until_ready(logits)
    ref = _reference(x, params, mask=None, heads=H)
    np.testing.assert_allclose(np.asarray(logits), np.asarray(ref),
                               rtol=2e-2, atol=2e-2)

    # exercise the key-padding mask path as well
    mask = (jnp.ones((B, N), dtype=bool)
            .at[1, N - 2:].set(False)
            .at[3, 0].set(False))
    logits_m = jax.block_until_ready(
        motion_decoder_positional(x, params, mask=mask, heads=H))
    ref_m = _reference(x, params, mask=mask, heads=H)
    np.testing.assert_allclose(np.asarray(logits_m), np.asarray(ref_m),
                               rtol=2e-2, atol=2e-2)

    print("KERNEL_OK")
</pallas_src>

<mosaic_0001>
module attributes {stable_mosaic.version = 11 : i64} {
  func.func @_decoder_kernel(%arg0: i32, %arg1: memref<4x8x32xf32, #tpu.memory_space<vmem>>, %arg2: memref<2x32xf32, #tpu.memory_space<vmem>>, %arg3: memref<32x96xbf16, #tpu.memory_space<vmem>>, %arg4: memref<1x96xf32, #tpu.memory_space<vmem>>, %arg5: memref<32x32xbf16, #tpu.memory_space<vmem>>, %arg6: memref<1x32xf32, #tpu.memory_space<vmem>>, %arg7: memref<2x32xf32, #tpu.memory_space<vmem>>, %arg8: memref<32x64xbf16, #tpu.memory_space<vmem>>, %arg9: memref<1x64xf32, #tpu.memory_space<vmem>>, %arg10: memref<64x32xbf16, #tpu.memory_space<vmem>>, %arg11: memref<1x32xf32, #tpu.memory_space<vmem>>, %arg12: memref<32x128xbf16, #tpu.memory_space<vmem>>, %arg13: memref<1x128xf32, #tpu.memory_space<vmem>>, %arg14: memref<4x8x128xf32, #tpu.memory_space<vmem>>, %arg15: memref<32x32xf32, #tpu.memory_space<vmem>>) attributes {dimension_semantics = [#tpu.dimension_semantics<parallel>], iteration_bounds = array<i64: 1>, scalar_prefetch = 0 : i64, scratch_operands = 1 : i64, tpu.core_type = #tpu.core_type<tc>, window_params = [{transform_indices = @transform_0, window_bounds = array<i64: 4, 8, 32>}, {pipeline_mode = #tpu.pipeline_mode<synchronous>, transform_indices = @transform_1, window_bounds = array<i64: 2, 32>}, {pipeline_mode = #tpu.pipeline_mode<synchronous>, transform_indices = @transform_2, window_bounds = array<i64: 32, 96>}, {pipeline_mode = #tpu.pipeline_mode<synchronous>, transform_indices = @transform_3, window_bounds = array<i64: 1, 96>}, {pipeline_mode = #tpu.pipeline_mode<synchronous>, transform_indices = @transform_4, window_bounds = array<i64: 32, 32>}, {pipeline_mode = #tpu.pipeline_mode<synchronous>, transform_indices = @transform_5, window_bounds = array<i64: 1, 32>}, {pipeline_mode = #tpu.pipeline_mode<synchronous>, transform_indices = @transform_6, window_bounds = array<i64: 2, 32>}, {pipeline_mode = #tpu.pipeline_mode<synchronous>, transform_indices = @transform_7, window_bounds = array<i64: 32, 64>}, {pipeline_mode = #tpu.pipeline_mode<synchronous>, transform_indices = @transform_8, window_bounds = array<i64: 1, 64>}, {pipeline_mode = #tpu.pipeline_mode<synchronous>, transform_indices = @transform_9, window_bounds = array<i64: 64, 32>}, {pipeline_mode = #tpu.pipeline_mode<synchronous>, transform_indices = @transform_10, window_bounds = array<i64: 1, 32>}, {pipeline_mode = #tpu.pipeline_mode<synchronous>, transform_indices = @transform_11, window_bounds = array<i64: 32, 128>}, {pipeline_mode = #tpu.pipeline_mode<synchronous>, transform_indices = @transform_12, window_bounds = array<i64: 1, 128>}, {transform_indices = @transform_13, window_bounds = array<i64: 4, 8, 128>}]} {
    %c0 = arith.constant 0 : index
    %c0_0 = arith.constant 0 : index
    %c0_1 = arith.constant 0 : index
    %0 = vector.load %arg1[%c0, %c0_0, %c0_1] : memref<4x8x32xf32, #tpu.memory_space<vmem>>, vector<4x8x32xf32>
    %1 = vector.shape_cast %0 : vector<4x8x32xf32> to vector<32x32xf32>
    %c0_2 = arith.constant 0 : index
    %c0_3 = arith.constant 0 : index
    %2 = vector.load %arg2[%c0_2, %c0_3] : memref<2x32xf32, #tpu.memory_space<vmem>>, vector<2x32xf32>
    %cst = arith.constant dense<0.000000e+00> : vector<32xf32>
    %3 = vector.multi_reduction <add>, %1, %cst [1] : vector<32x32xf32> to vector<32xf32>
    %4 = vector.shape_cast %3 : vector<32xf32> to vector<32x1xf32>
    %cst_4 = arith.constant 3.200000e+01 : f32
    %5 = vector.broadcast %cst_4 : f32 to vector<32x1xf32>
    %6 = arith.divf %4, %5 : vector<32x1xf32>
    %7 = vector.broadcast %6 : vector<32x1xf32> to vector<32x32xf32>
    %8 = arith.subf %1, %7 : vector<32x32xf32>
    %9 = vector.broadcast %6 : vector<32x1xf32> to vector<32x32xf32>
    %10 = arith.subf %1, %9 : vector<32x32xf32>
    %11 = arith.mulf %8, %10 : vector<32x32xf32>
    %cst_5 = arith.constant dense<0.000000e+00> : vector<32xf32>
    %12 = vector.multi_reduction <add>, %11, %cst_5 [1] : vector<32x32xf32> to vector<32xf32>
    %13 = vector.shape_cast %12 : vector<32xf32> to vector<32x1xf32>
    %cst_6 = arith.constant 3.200000e+01 : f32
    %14 = vector.broadcast %cst_6 : f32 to vector<32x1xf32>
    %15 = arith.divf %13, %14 : vector<32x1xf32>
    %16 = vector.broadcast %6 : vector<32x1xf32> to vector<32x32xf32>
    %17 = arith.subf %1, %16 : vector<32x32xf32>
    %cst_7 = arith.constant 9.99999974E-6 : f32
    %18 = vector.broadcast %cst_7 : f32 to vector<32x1xf32>
    %19 = arith.addf %15, %18 : vector<32x1xf32>
    %20 = math.rsqrt %19 : vector<32x1xf32>
    %21 = vector.broadcast %20 : vector<32x1xf32> to vector<32x32xf32>
    %22 = arith.mulf %17, %21 : vector<32x32xf32>
    %23 = vector.extract_strided_slice %2 {offsets = [0, 0], sizes = [1, 32], strides = [1, 1]} : vector<2x32xf32> to vector<1x32xf32>
    %24 = vector.broadcast %23 : vector<1x32xf32> to vector<32x32xf32>
    %25 = arith.mulf %22, %24 : vector<32x32xf32>
    %26 = vector.extract_strided_slice %2 {offsets = [1, 0], sizes = [1, 32], strides = [1, 1]} : vector<2x32xf32> to vector<1x32xf32>
    %27 = vector.broadcast %26 : vector<1x32xf32> to vector<32x32xf32>
    %28 = arith.addf %25, %27 : vector<32x32xf32>
    %29 = arith.truncf %28 : vector<32x32xf32> to vector<32x32xbf16>
    %c0_8 = arith.constant 0 : index
    %c0_9 = arith.constant 0 : index
    %30 = vector.load %arg3[%c0_8, %c0_9] : memref<32x96xbf16, #tpu.memory_space<vmem>>, vector<32x96xbf16>
    %cst_10 = arith.constant dense<0.000000e+00> : vector<32x96xf32>
    %31 = tpu.matmul %29, %30, %cst_10 {dimension_numbers = #tpu.dot_dimension_numbers<[1], [0], [0], [1], [0, 0, 1, 1], [], []>} : vector<32x32xbf16>, vector<32x96xbf16>, vector<32x96xf32> -> vector<32x96xf32>
    %c0_11 = arith.constant 0 : index
    %c0_12 = arith.constant 0 : index
    %32 = vector.load %arg4[%c0_11, %c0_12] : memref<1x96xf32, #tpu.memory_space<vmem>>, vector<1x96xf32>
    %33 = vector.broadcast %32 : vector<1x96xf32> to vector<32x96xf32>
    %34 = arith.addf %31, %33 : vector<32x96xf32>
    %35 = vector.extract_strided_slice %34 {offsets = [0, 0], sizes = [8, 96], strides = [1, 1]} : vector<32x96xf32> to vector<8x96xf32>
    %36 = arith.truncf %35 : vector<8x96xf32> to vector<8x96xbf16>
    %37 = vector.extract_strided_slice %36 {offsets = [0, 0], sizes = [8, 8], strides = [1, 1]} : vector<8x96xbf16> to vector<8x8xbf16>
    %38 = vector.extract_strided_slice %36 {offsets = [0, 32], sizes = [8, 8], strides = [1, 1]} : vector<8x96xbf16> to vector<8x8xbf16>
    %39 = vector.extract_strided_slice %36 {offsets = [0, 64], sizes = [8, 8], strides = [1, 1]} : vector<8x96xbf16> to vector<8x8xbf16>
    %cst_13 = arith.constant dense<0.000000e+00> : vector<8x8xf32>
    %40 = tpu.matmul %37, %38, %cst_13 {dimension_numbers = #tpu.dot_dimension_numbers<[1], [1], [0], [0], [0, 0, 1, 0], [], []>} : vector<8x8xbf16>, vector<8x8xbf16>, vector<8x8xf32> -> vector<8x8xf32>
    %cst_14 = arith.constant dense<0xFF800000> : vector<8xf32>
    %41 = vector.multi_reduction <maximumf>, %40, %cst_14 [1] : vector<8x8xf32> to vector<8xf32>
    %42 = vector.shape_cast %41 : vector<8xf32> to vector<8x1xf32>
    %43 = vector.broadcast %42 : vector<8x1xf32> to vector<8x8xf32>
    %44 = arith.subf %40, %43 : vector<8x8xf32>
    %45 = math.exp %44 : vector<8x8xf32>
    %cst_15 = arith.constant dense<0.000000e+00> : vector<8xf32>
    %46 = vector.multi_reduction <add>, %45, %cst_15 [1] : vector<8x8xf32> to vector<8xf32>
    %47 = vector.shape_cast %46 : vector<8xf32> to vector<8x1xf32>
    %48 = tpu.reciprocal %47 {approx = true} : vector<8x1xf32> -> vector<8x1xf32>
    %49 = vector.broadcast %48 : vector<8x1xf32> to vector<8x8xf32>
    %50 = arith.mulf %45, %49 : vector<8x8xf32>
    %51 = arith.truncf %50 : vector<8x8xf32> to vector<8x8xbf16>
    %cst_16 = arith.constant dense<0.000000e+00> : vector<8x8xf32>
    %52 = tpu.matmul %51, %39, %cst_16 {dimension_numbers = #tpu.dot_dimension_numbers<[1], [0], [0], [1], [0, 0, 1, 1], [], []>} : vector<8x8xbf16>, vector<8x8xbf16>, vector<8x8xf32> -> vector<8x8xf32>
    %c0_17 = arith.constant 0 : index
    %c0_18 = arith.constant 0 : index
    %53 = vector.load %arg15[%c0_17, %c0_18] : memref<32x32xf32, #tpu.memory_space<vmem>>, vector<8x8xf32>
    tpu.vector_store %arg15[%c0_17, %c0_18], %52 {strides = array<i32>} : memref<32x32xf32, #tpu.memory_space<vmem>>, vector<8x8xf32>,
    %54 = vector.extract_strided_slice %36 {offsets = [0, 8], sizes = [8, 8], strides = [1, 1]} : vector<8x96xbf16> to vector<8x8xbf16>
    %55 = vector.extract_strided_slice %36 {offsets = [0, 40], sizes = [8, 8], strides = [1, 1]} : vector<8x96xbf16> to vector<8x8xbf16>
    %56 = vector.extract_strided_slice %36 {offsets = [0, 72], sizes = [8, 8], strides = [1, 1]} : vector<8x96xbf16> to vector<8x8xbf16>
    %cst_19 = arith.constant dense<0.000000e+00> : vector<8x8xf32>
    %57 = tpu.matmul %54, %55, %cst_19 {dimension_numbers = #tpu.dot_dimension_numbers<[1], [1], [0], [0], [0, 0, 1, 0], [], []>} : vector<8x8xbf16>, vector<8x8xbf16>, vector<8x8xf32> -> vector<8x8xf32>
    %cst_20 = arith.constant dense<0xFF800000> : vector<8xf32>
    %58 = vector.multi_reduction <maximumf>, %57, %cst_20 [1] : vector<8x8xf32> to vector<8xf32>
    %59 = vector.shape_cast %58 : vector<8xf32> to vector<8x1xf32>
    %60 = vector.broadcast %59 : vector<8x1xf32> to vector<8x8xf32>
    %61 = arith.subf %57, %60 : vector<8x8xf32>
    %62 = math.exp %61 : vector<8x8xf32>
    %cst_21 = arith.constant dense<0.000000e+00> : vector<8xf32>
    %63 = vector.multi_reduction <add>, %62, %cst_21 [1] : vector<8x8xf32> to vector<8xf32>
    %64 = vector.shape_cast %63 : vector<8xf32> to vector<8x1xf32>
    %65 = tpu.reciprocal %64 {approx = true} : vector<8x1xf32> -> vector<8x1xf32>
    %66 = vector.broadcast %65 : vector<8x1xf32> to vector<8x8xf32>
    %67 = arith.mulf %62, %66 : vector<8x8xf32>
    %68 = arith.truncf %67 : vector<8x8xf32> to vector<8x8xbf16>
    %cst_22 = arith.constant dense<0.000000e+00> : vector<8x8xf32>
    %69 = tpu.matmul %68, %56, %cst_22 {dimension_numbers = #tpu.dot_dimension_numbers<[1], [0], [0], [1], [0, 0, 1, 1], [], []>} : vector<8x8xbf16>, vector<8x8xbf16>, vector<8x8xf32> -> vector<8x8xf32>
    %c0_23 = arith.constant 0 : index
    %c8 = arith.constant 8 : index
    %70 = vector.load %arg15[%c0_23, %c8] : memref<32x32xf32, #tpu.memory_space<vmem>>, vector<8x8xf32>
    tpu.vector_store %arg15[%c0_23, %c8], %69 {strides = array<i32>} : memref<32x32xf32, #tpu.memory_space<vmem>>, vector<8x8xf32>,
    %71 = vector.extract_strided_slice %36 {offsets = [0, 16], sizes = [8, 8], strides = [1, 1]} : vector<8x96xbf16> to vector<8x8xbf16>
    %72 = vector.extract_strided_slice %36 {offsets = [0, 48], sizes = [8, 8], strides = [1, 1]} : vector<8x96xbf16> to vector<8x8xbf16>
    %73 = vector.extract_strided_slice %36 {offsets = [0, 80], sizes = [8, 8], strides = [1, 1]} : vector<8x96xbf16> to vector<8x8xbf16>
    %cst_24 = arith.constant dense<0.000000e+00> : vector<8x8xf32>
    %74 = tpu.matmul %71, %72, %cst_24 {dimension_numbers = #tpu.dot_dimension_numbers<[1], [1], [0], [0], [0, 0, 1, 0], [], []>} : vector<8x8xbf16>, vector<8x8xbf16>, vector<8x8xf32> -> vector<8x8xf32>
    %cst_25 = arith.constant dense<0xFF800000> : vector<8xf32>
    %75 = vector.multi_reduction <maximumf>, %74, %cst_25 [1] : vector<8x8xf32> to vector<8xf32>
    %76 = vector.shape_cast %75 : vector<8xf32> to vector<8x1xf32>
    %77 = vector.broadcast %76 : vector<8x1xf32> to vector<8x8xf32>
    %78 = arith.subf %74, %77 : vector<8x8xf32>
    %79 = math.exp %78 : vector<8x8xf32>
    %cst_26 = arith.constant dense<0.000000e+00> : vector<8xf32>
    %80 = vector.multi_reduction <add>, %79, %cst_26 [1] : vector<8x8xf32> to vector<8xf32>
    %81 = vector.shape_cast %80 : vector<8xf32> to vector<8x1xf32>
    %82 = tpu.reciprocal %81 {approx = true} : vector<8x1xf32> -> vector<8x1xf32>
    %83 = vector.broadcast %82 : vector<8x1xf32> to vector<8x8xf32>
    %84 = arith.mulf %79, %83 : vector<8x8xf32>
    %85 = arith.truncf %84 : vector<8x8xf32> to vector<8x8xbf16>
    %cst_27 = arith.constant dense<0.000000e+00> : vector<8x8xf32>
    %86 = tpu.matmul %85, %73, %cst_27 {dimension_numbers = #tpu.dot_dimension_numbers<[1], [0], [0], [1], [0, 0, 1, 1], [], []>} : vector<8x8xbf16>, vector<8x8xbf16>, vector<8x8xf32> -> vector<8x8xf32>
    %c0_28 = arith.constant 0 : index
    %c16 = arith.constant 16 : index
    %87 = vector.load %arg15[%c0_28, %c16] : memref<32x32xf32, #tpu.memory_space<vmem>>, vector<8x8xf32>
    tpu.vector_store %arg15[%c0_28, %c16], %86 {strides = array<i32>} : memref<32x32xf32, #tpu.memory_space<vmem>>, vector<8x8xf32>,
    %88 = vector.extract_strided_slice %36 {offsets = [0, 24], sizes = [8, 8], strides = [1, 1]} : vector<8x96xbf16> to vector<8x8xbf16>
    %89 = vector.extract_strided_slice %36 {offsets = [0, 56], sizes = [8, 8], strides = [1, 1]} : vector<8x96xbf16> to vector<8x8xbf16>
    %90 = vector.extract_strided_slice %36 {offsets = [0, 88], sizes = [8, 8], strides = [1, 1]} : vector<8x96xbf16> to vector<8x8xbf16>
    %cst_29 = arith.constant dense<0.000000e+00> : vector<8x8xf32>
    %91 = tpu.matmul %88, %89, %cst_29 {dimension_numbers = #tpu.dot_dimension_numbers<[1], [1], [0], [0], [0, 0, 1, 0], [], []>} : vector<8x8xbf16>, vector<8x8xbf16>, vector<8x8xf32> -> vector<8x8xf32>
    %cst_30 = arith.constant dense<0xFF800000> : vector<8xf32>
    %92 = vector.multi_reduction <maximumf>, %91, %cst_30 [1] : vector<8x8xf32> to vector<8xf32>
    %93 = vector.shape_cast %92 : vector<8xf32> to vector<8x1xf32>
    %94 = vector.broadcast %93 : vector<8x1xf32> to vector<8x8xf32>
    %95 = arith.subf %91, %94 : vector<8x8xf32>
    %96 = math.exp %95 : vector<8x8xf32>
    %cst_31 = arith.constant dense<0.000000e+00> : vector<8xf32>
    %97 = vector.multi_reduction <add>, %96, %cst_31 [1] : vector<8x8xf32> to vector<8xf32>
    %98 = vector.shape_cast %97 : vector<8xf32> to vector<8x1xf32>
    %99 = tpu.reciprocal %98 {approx = true} : vector<8x1xf32> -> vector<8x1xf32>
    %100 = vector.broadcast %99 : vector<8x1xf32> to vector<8x8xf32>
    %101 = arith.mulf %96, %100 : vector<8x8xf32>
    %102 = arith.truncf %101 : vector<8x8xf32> to vector<8x8xbf16>
    %cst_32 = arith.constant dense<0.000000e+00> : vector<8x8xf32>
    %103 = tpu.matmul %102, %90, %cst_32 {dimension_numbers = #tpu.dot_dimension_numbers<[1], [0], [0], [1], [0, 0, 1, 1], [], []>} : vector<8x8xbf16>, vector<8x8xbf16>, vector<8x8xf32> -> vector<8x8xf32>
    %c0_33 = arith.constant 0 : index
    %c24 = arith.constant 24 : index
    %104 = vector.load %arg15[%c0_33, %c24] : memref<32x32xf32, #tpu.memory_space<vmem>>, vector<8x8xf32>
    tpu.vector_store %arg15[%c0_33, %c24], %103 {strides = array<i32>} : memref<32x32xf32, #tpu.memory_space<vmem>>, vector<8x8xf32>,
    %105 = vector.extract_strided_slice %34 {offsets = [8, 0], sizes = [8, 96], strides = [1, 1]} : vector<32x96xf32> to vector<8x96xf32>
    %106 = arith.truncf %105 : vector<8x96xf32> to vector<8x96xbf16>
    %107 = vector.extract_strided_slice %106 {offsets = [0, 0], sizes = [8, 8], strides = [1, 1]} : vector<8x96xbf16> to vector<8x8xbf16>
    %108 = vector.extract_strided_slice %106 {offsets = [0, 32], sizes = [8, 8], strides = [1, 1]} : vector<8x96xbf16> to vector<8x8xbf16>
    %109 = vector.extract_strided_slice %106 {offsets = [0, 64], sizes = [8, 8], strides = [1, 1]} : vector<8x96xbf16> to vector<8x8xbf16>
    %cst_34 = arith.constant dense<0.000000e+00> : vector<8x8xf32>
    %110 = tpu.matmul %107, %108, %cst_34 {dimension_numbers = #tpu.dot_dimension_numbers<[1], [1], [0], [0], [0, 0, 1, 0], [], []>} : vector<8x8xbf16>, vector<8x8xbf16>, vector<8x8xf32> -> vector<8x8xf32>
    %cst_35 = arith.constant dense<0xFF800000> : vector<8xf32>
    %111 = vector.multi_reduction <maximumf>, %110, %cst_35 [1] : vector<8x8xf32> to vector<8xf32>
    %112 = vector.shape_cast %111 : vector<8xf32> to vector<8x1xf32>
    %113 = vector.broadcast %112 : vector<8x1xf32> to vector<8x8xf32>
    %114 = arith.subf %110, %113 : vector<8x8xf32>
    %115 = math.exp %114 : vector<8x8xf32>
    %cst_36 = arith.constant dense<0.000000e+00> : vector<8xf32>
    %116 = vector.multi_reduction <add>, %115, %cst_36 [1] : vector<8x8xf32> to vector<8xf32>
    %117 = vector.shape_cast %116 : vector<8xf32> to vector<8x1xf32>
    %118 = tpu.reciprocal %117 {approx = true} : vector<8x1xf32> -> vector<8x1xf32>
    %119 = vector.broadcast %118 : vector<8x1xf32> to vector<8x8xf32>
    %120 = arith.mulf %115, %119 : vector<8x8xf32>
    %121 = arith.truncf %120 : vector<8x8xf32> to vector<8x8xbf16>
    %cst_37 = arith.constant dense<0.000000e+00> : vector<8x8xf32>
    %122 = tpu.matmul %121, %109, %cst_37 {dimension_numbers = #tpu.dot_dimension_numbers<[1], [0], [0], [1], [0, 0, 1, 1], [], []>} : vector<8x8xbf16>, vector<8x8xbf16>, vector<8x8xf32> -> vector<8x8xf32>
    %c8_38 = arith.constant 8 : index
    %c0_39 = arith.constant 0 : index
    %123 = vector.load %arg15[%c8_38, %c0_39] : memref<32x32xf32, #tpu.memory_space<vmem>>, vector<8x8xf32>
    tpu.vector_store %arg15[%c8_38, %c0_39], %122 {strides = array<i32>} : memref<32x32xf32, #tpu.memory_space<vmem>>, vector<8x8xf32>,
    %124 = vector.extract_strided_slice %106 {offsets = [0, 8], sizes = [8, 8], strides = [1, 1]} : vector<8x96xbf16> to vector<8x8xbf16>
    %125 = vector.extract_strided_slice %106 {offsets = [0, 40], sizes = [8, 8], strides = [1, 1]} : vector<8x96xbf16> to vector<8x8xbf16>
    %126 = vector.extract_strided_slice %106 {offsets = [0, 72], sizes = [8, 8], strides = [1, 1]} : vector<8x96xbf16> to vector<8x8xbf16>
    %cst_40 = arith.constant dense<0.000000e+00> : vector<8x8xf32>
    %127 = tpu.matmul %124, %125, %cst_40 {dimension_numbers = #tpu.dot_dimension_numbers<[1], [1], [0], [0], [0, 0, 1, 0], [], []>} : vector<8x8xbf16>, vector<8x8xbf16>, vector<8x8xf32> -> vector<8x8xf32>
    %cst_41 = arith.constant dense<0xFF800000> : vector<8xf32>
    %128 = vector.multi_reduction <maximumf>, %127, %cst_41 [1] : vector<8x8xf32> to vector<8xf32>
    %129 = vector.shape_cast %128 : vector<8xf32> to vector<8x1xf32>
    %130 = vector.broadcast %129 : vector<8x1xf32> to vector<8x8xf32>
    %131 = arith.subf %127, %130 : vector<8x8xf32>
    %132 = math.exp %131 : vector<8x8xf32>
    %cst_42 = arith.constant dense<0.000000e+00> : vector<8xf32>
    %133 = vector.multi_reduction <add>, %132, %cst_42 [1] : vector<8x8xf32> to vector<8xf32>
    %134 = vector.shape_cast %133 : vector<8xf32> to vector<8x1xf32>
    %135 = tpu.reciprocal %134 {approx = true} : vector<8x1xf32> -> vector<8x1xf32>
    %136 = vector.broadcast %135 : vector<8x1xf32> to vector<8x8xf32>
    %137 = arith.mulf %132, %136 : vector<8x8xf32>
    %138 = arith.truncf %137 : vector<8x8xf32> to vector<8x8xbf16>
    %cst_43 = arith.constant dense<0.000000e+00> : vector<8x8xf32>
    %139 = tpu.matmul %138, %126, %cst_43 {dimension_numbers = #tpu.dot_dimension_numbers<[1], [0], [0], [1], [0, 0, 1, 1], [], []>} : vector<8x8xbf16>, vector<8x8xbf16>, vector<8x8xf32> -> vector<8x8xf32>
    %c8_44 = arith.constant 8 : index
    %c8_45 = arith.constant 8 : index
    %140 = vector.load %arg15[%c8_44, %c8_45] : memref<32x32xf32, #tpu.memory_space<vmem>>, vector<8x8xf32>
    tpu.vector_store %arg15[%c8_44, %c8_45], %139 {strides = array<i32>} : memref<32x32xf32, #tpu.memory_space<vmem>>, vector<8x8xf32>,
    %141 = vector.extract_strided_slice %106 {offsets = [0, 16], sizes = [8, 8], strides = [1, 1]} : vector<8x96xbf16> to vector<8x8xbf16>
    %142 = vector.extract_strided_slice %106 {offsets = [0, 48], sizes = [8, 8], strides = [1, 1]} : vector<8x96xbf16> to vector<8x8xbf16>
    %143 = vector.extract_strided_slice %106 {offsets = [0, 80], sizes = [8, 8], strides = [1, 1]} : vector<8x96xbf16> to vector<8x8xbf16>
    %cst_46 = arith.constant dense<0.000000e+00> : vector<8x8xf32>
    %144 = tpu.matmul %141, %142, %cst_46 {dimension_numbers = #tpu.dot_dimension_numbers<[1], [1], [0], [0], [0, 0, 1, 0], [], []>} : vector<8x8xbf16>, vector<8x8xbf16>, vector<8x8xf32> -> vector<8x8xf32>
    %cst_47 = arith.constant dense<0xFF800000> : vector<8xf32>
    %145 = vector.multi_reduction <maximumf>, %144, %cst_47 [1] : vector<8x8xf32> to vector<8xf32>
    %146 = vector.shape_cast %145 : vector<8xf32> to vector<8x1xf32>
    %147 = vector.broadcast %146 : vector<8x1xf32> to vector<8x8xf32>
    %148 = arith.subf %144, %147 : vector<8x8xf32>
    %149 = math.exp %148 : vector<8x8xf32>
    %cst_48 = arith.constant dense<0.000000e+00> : vector<8xf32>
    %150 = vector.multi_reduction <add>, %149, %cst_48 [1] : vector<8x8xf32> to vector<8xf32>
    %151 = vector.shape_cast %150 : vector<8xf32> to vector<8x1xf32>
    %152 = tpu.reciprocal %151 {approx = true} : vector<8x1xf32> -> vector<8x1xf32>
    %153 = vector.broadcast %152 : vector<8x1xf32> to vector<8x8xf32>
    %154 = arith.mulf %149, %153 : vector<8x8xf32>
    %155 = arith.truncf %154 : vector<8x8xf32> to vector<8x8xbf16>
    %cst_49 = arith.constant dense<0.000000e+00> : vector<8x8xf32>
    %156 = tpu.matmul %155, %143, %cst_49 {dimension_numbers = #tpu.dot_dimension_numbers<[1], [0], [0], [1], [0, 0, 1, 1], [], []>} : vector<8x8xbf16>, vector<8x8xbf16>, vector<8x8xf32> -> vector<8x8xf32>
    %c8_50 = arith.constant 8 : index
    %c16_51 = arith.constant 16 : index
    %157 = vector.load %arg15[%c8_50, %c16_51] : memref<32x32xf32, #tpu.memory_space<vmem>>, vector<8x8xf32>
    tpu.vector_store %arg15[%c8_50, %c16_51], %156 {strides = array<i32>} : memref<32x32xf32, #tpu.memory_space<vmem>>, vector<8x8xf32>,
    %158 = vector.extract_strided_slice %106 {offsets = [0, 24], sizes = [8, 8], strides = [1, 1]} : vector<8x96xbf16> to vector<8x8xbf16>
    %159 = vector.extract_strided_slice %106 {offsets = [0, 56], sizes = [8, 8], strides = [1, 1]} : vector<8x96xbf16> to vector<8x8xbf16>
    %160 = vector.extract_strided_slice %106 {offsets = [0, 88], sizes = [8, 8], strides = [1, 1]} : vector<8x96xbf16> to vector<8x8xbf16>
    %cst_52 = arith.constant dense<0.000000e+00> : vector<8x8xf32>
    %161 = tpu.matmul %158, %159, %cst_52 {dimension_numbers = #tpu.dot_dimension_numbers<[1], [1], [0], [0], [0, 0, 1, 0], [], []>} : vector<8x8xbf16>, vector<8x8xbf16>, vector<8x8xf32> -> vector<8x8xf32>
    %cst_53 = arith.constant dense<0xFF800000> : vector<8xf32>
    %162 = vector.multi_reduction <maximumf>, %161, %cst_53 [1] : vector<8x8xf32> to vector<8xf32>
    %163 = vector.shape_cast %162 : vector<8xf32> to vector<8x1xf32>
    %164 = vector.broadcast %163 : vector<8x1xf32> to vector<8x8xf32>
    %165 = arith.subf %161, %164 : vector<8x8xf32>
    %166 = math.exp %165 : vector<8x8xf32>
    %cst_54 = arith.constant dense<0.000000e+00> : vector<8xf32>
    %167 = vector.multi_reduction <add>, %166, %cst_54 [1] : vector<8x8xf32> to vector<8xf32>
    %168 = vector.shape_cast %167 : vector<8xf32> to vector<8x1xf32>
    %169 = tpu.reciprocal %168 {approx = true} : vector<8x1xf32> -> vector<8x1xf32>
    %170 = vector.broadcast %169 : vector<8x1xf32> to vector<8x8xf32>
    %171 = arith.mulf %166, %170 : vector<8x8xf32>
    %172 = arith.truncf %171 : vector<8x8xf32> to vector<8x8xbf16>
    %cst_55 = arith.constant dense<0.000000e+00> : vector<8x8xf32>
    %173 = tpu.matmul %172, %160, %cst_55 {dimension_numbers = #tpu.dot_dimension_numbers<[1], [0], [0], [1], [0, 0, 1, 1], [], []>} : vector<8x8xbf16>, vector<8x8xbf16>, vector<8x8xf32> -> vector<8x8xf32>
    %c8_56 = arith.constant 8 : index
    %c24_57 = arith.constant 24 : index
    %174 = vector.load %arg15[%c8_56, %c24_57] : memref<32x32xf32, #tpu.memory_space<vmem>>, vector<8x8xf32>
    tpu.vector_store %arg15[%c8_56, %c24_57], %173 {strides = array<i32>} : memref<32x32xf32, #tpu.memory_space<vmem>>, vector<8x8xf32>,
    %175 = vector.extract_strided_slice %34 {offsets = [16, 0], sizes = [8, 96], strides = [1, 1]} : vector<32x96xf32> to vector<8x96xf32>
    %176 = arith.truncf %175 : vector<8x96xf32> to vector<8x96xbf16>
    %177 = vector.extract_strided_slice %176 {offsets = [0, 0], sizes = [8, 8], strides = [1, 1]} : vector<8x96xbf16> to vector<8x8xbf16>
    %178 = vector.extract_strided_slice %176 {offsets = [0, 32], sizes = [8, 8], strides = [1, 1]} : vector<8x96xbf16> to vector<8x8xbf16>
    %179 = vector.extract_strided_slice %176 {offsets = [0, 64], sizes = [8, 8], strides = [1, 1]} : vector<8x96xbf16> to vector<8x8xbf16>
    %cst_58 = arith.constant dense<0.000000e+00> : vector<8x8xf32>
    %180 = tpu.matmul %177, %178, %cst_58 {dimension_numbers = #tpu.dot_dimension_numbers<[1], [1], [0], [0], [0, 0, 1, 0], [], []>} : vector<8x8xbf16>, vector<8x8xbf16>, vector<8x8xf32> -> vector<8x8xf32>
    %cst_59 = arith.constant dense<0xFF800000> : vector<8xf32>
    %181 = vector.multi_reduction <maximumf>, %180, %cst_59 [1] : vector<8x8xf32> to vector<8xf32>
    %182 = vector.shape_cast %181 : vector<8xf32> to vector<8x1xf32>
    %183 = vector.broadcast %182 : vector<8x1xf32> to vector<8x8xf32>
    %184 = arith.subf %180, %183 : vector<8x8xf32>
    %185 = math.exp %184 : vector<8x8xf32>
    %cst_60 = arith.constant dense<0.000000e+00> : vector<8xf32>
    %186 = vector.multi_reduction <add>, %185, %cst_60 [1] : vector<8x8xf32> to vector<8xf32>
    %187 = vector.shape_cast %186 : vector<8xf32> to vector<8x1xf32>
    %188 = tpu.reciprocal %187 {approx = true} : vector<8x1xf32> -> vector<8x1xf32>
    %189 = vector.broadcast %188 : vector<8x1xf32> to vector<8x8xf32>
    %190 = arith.mulf %185, %189 : vector<8x8xf32>
    %191 = arith.truncf %190 : vector<8x8xf32> to vector<8x8xbf16>
    %cst_61 = arith.constant dense<0.000000e+00> : vector<8x8xf32>
    %192 = tpu.matmul %191, %179, %cst_61 {dimension_numbers = #tpu.dot_dimension_numbers<[1], [0], [0], [1], [0, 0, 1, 1], [], []>} : vector<8x8xbf16>, vector<8x8xbf16>, vector<8x8xf32> -> vector<8x8xf32>
    %c16_62 = arith.constant 16 : index
    %c0_63 = arith.constant 0 : index
    %193 = vector.load %arg15[%c16_62, %c0_63] : memref<32x32xf32, #tpu.memory_space<vmem>>, vector<8x8xf32>
    tpu.vector_store %arg15[%c16_62, %c0_63], %192 {strides = array<i32>} : memref<32x32xf32, #tpu.memory_space<vmem>>, vector<8x8xf32>,
    %194 = vector.extract_strided_slice %176 {offsets = [0, 8], sizes = [8, 8], strides = [1, 1]} : vector<8x96xbf16> to vector<8x8xbf16>
    %195 = vector.extract_strided_slice %176 {offsets = [0, 40], sizes = [8, 8], strides = [1, 1]} : vector<8x96xbf16> to vector<8x8xbf16>
    %196 = vector.extract_strided_slice %176 {offsets = [0, 72], sizes = [8, 8], strides = [1, 1]} : vector<8x96xbf16> to vector<8x8xbf16>
    %cst_64 = arith.constant dense<0.000000e+00> : vector<8x8xf32>
    %197 = tpu.matmul %194, %195, %cst_64 {dimension_numbers = #tpu.dot_dimension_numbers<[1], [1], [0], [0], [0, 0, 1, 0], [], []>} : vector<8x8xbf16>, vector<8x8xbf16>, vector<8x8xf32> -> vector<8x8xf32>
    %cst_65 = arith.constant dense<0xFF800000> : vector<8xf32>
    %198 = vector.multi_reduction <maximumf>, %197, %cst_65 [1] : vector<8x8xf32> to vector<8xf32>
    %199 = vector.shape_cast %198 : vector<8xf32> to vector<8x1xf32>
    %200 = vector.broadcast %199 : vector<8x1xf32> to vector<8x8xf32>
    %201 = arith.subf %197, %200 : vector<8x8xf32>
    %202 = math.exp %201 : vector<8x8xf32>
    %cst_66 = arith.constant dense<0.000000e+00> : vector<8xf32>
    %203 = vector.multi_reduction <add>, %202, %cst_66 [1] : vector<8x8xf32> to vector<8xf32>
    %204 = vector.shape_cast %203 : vector<8xf32> to vector<8x1xf32>
    %205 = tpu.reciprocal %204 {approx = true} : vector<8x1xf32> -> vector<8x1xf32>
    %206 = vector.broadcast %205 : vector<8x1xf32> to vector<8x8xf32>
    %207 = arith.mulf %202, %206 : vector<8x8xf32>
    %208 = arith.truncf %207 : vector<8x8xf32> to vector<8x8xbf16>
    %cst_67 = arith.constant dense<0.000000e+00> : vector<8x8xf32>
    %209 = tpu.matmul %208, %196, %cst_67 {dimension_numbers = #tpu.dot_dimension_numbers<[1], [0], [0], [1], [0, 0, 1, 1], [], []>} : vector<8x8xbf16>, vector<8x8xbf16>, vector<8x8xf32> -> vector<8x8xf32>
    %c16_68 = arith.constant 16 : index
    %c8_69 = arith.constant 8 : index
    %210 = vector.load %arg15[%c16_68, %c8_69] : memref<32x32xf32, #tpu.memory_space<vmem>>, vector<8x8xf32>
    tpu.vector_store %arg15[%c16_68, %c8_69], %209 {strides = array<i32>} : memref<32x32xf32, #tpu.memory_space<vmem>>, vector<8x8xf32>,
    %211 = vector.extract_strided_slice %176 {offsets = [0, 16], sizes = [8, 8], strides = [1, 1]} : vector<8x96xbf16> to vector<8x8xbf16>
    %212 = vector.extract_strided_slice %176 {offsets = [0, 48], sizes = [8, 8], strides = [1, 1]} : vector<8x96xbf16> to vector<8x8xbf16>
    %213 = vector.extract_strided_slice %176 {offsets = [0, 80], sizes = [8, 8], strides = [1, 1]} : vector<8x96xbf16> to vector<8x8xbf16>
    %cst_70 = arith.constant dense<0.000000e+00> : vector<8x8xf32>
    %214 = tpu.matmul %211, %212, %cst_70 {dimension_numbers = #tpu.dot_dimension_numbers<[1], [1], [0], [0], [0, 0, 1, 0], [], []>} : vector<8x8xbf16>, vector<8x8xbf16>, vector<8x8xf32> -> vector<8x8xf32>
    %cst_71 = arith.constant dense<0xFF800000> : vector<8xf32>
    %215 = vector.multi_reduction <maximumf>, %214, %cst_71 [1] : vector<8x8xf32> to vector<8xf32>
    %216 = vector.shape_cast %215 : vector<8xf32> to vector<8x1xf32>
    %217 = vector.broadcast %216 : vector<8x1xf32> to vector<8x8xf32>
    %218 = arith.subf %214, %217 : vector<8x8xf32>
    %219 = math.exp %218 : vector<8x8xf32>
    %cst_72 = arith.constant dense<0.000000e+00> : vector<8xf32>
    %220 = vector.multi_reduction <add>, %219, %cst_72 [1] : vector<8x8xf32> to vector<8xf32>
    %221 = vector.shape_cast %220 : vector<8xf32> to vector<8x1xf32>
    %222 = tpu.reciprocal %221 {approx = true} : vector<8x1xf32> -> vector<8x1xf32>
    %223 = vector.broadcast %222 : vector<8x1xf32> to vector<8x8xf32>
    %224 = arith.mulf %219, %223 : vector<8x8xf32>
    %225 = arith.truncf %224 : vector<8x8xf32> to vector<8x8xbf16>
    %cst_73 = arith.constant dense<0.000000e+00> : vector<8x8xf32>
    %226 = tpu.matmul %225, %213, %cst_73 {dimension_numbers = #tpu.dot_dimension_numbers<[1], [0], [0], [1], [0, 0, 1, 1], [], []>} : vector<8x8xbf16>, vector<8x8xbf16>, vector<8x8xf32> -> vector<8x8xf32>
    %c16_74 = arith.constant 16 : index
    %c16_75 = arith.constant 16 : index
    %227 = vector.load %arg15[%c16_74, %c16_75] : memref<32x32xf32, #tpu.memory_space<vmem>>, vector<8x8xf32>
    tpu.vector_store %arg15[%c16_74, %c16_75], %226 {strides = array<i32>} : memref<32x32xf32, #tpu.memory_space<vmem>>, vector<8x8xf32>,
    %228 = vector.extract_strided_slice %176 {offsets = [0, 24], sizes = [8, 8], strides = [1, 1]} : vector<8x96xbf16> to vector<8x8xbf16>
    %229 = vector.extract_strided_slice %176 {offsets = [0, 56], sizes = [8, 8], strides = [1, 1]} : vector<8x96xbf16> to vector<8x8xbf16>
    %230 = vector.extract_strided_slice %176 {offsets = [0, 88], sizes = [8, 8], strides = [1, 1]} : vector<8x96xbf16> to vector<8x8xbf16>
    %cst_76 = arith.constant dense<0.000000e+00> : vector<8x8xf32>
    %231 = tpu.matmul %228, %229, %cst_76 {dimension_numbers = #tpu.dot_dimension_numbers<[1], [1], [0], [0], [0, 0, 1, 0], [], []>} : vector<8x8xbf16>, vector<8x8xbf16>, vector<8x8xf32> -> vector<8x8xf32>
    %cst_77 = arith.constant dense<0xFF800000> : vector<8xf32>
    %232 = vector.multi_reduction <maximumf>, %231, %cst_77 [1] : vector<8x8xf32> to vector<8xf32>
    %233 = vector.shape_cast %232 : vector<8xf32> to vector<8x1xf32>
    %234 = vector.broadcast %233 : vector<8x1xf32> to vector<8x8xf32>
    %235 = arith.subf %231, %234 : vector<8x8xf32>
    %236 = math.exp %235 : vector<8x8xf32>
    %cst_78 = arith.constant dense<0.000000e+00> : vector<8xf32>
    %237 = vector.multi_reduction <add>, %236, %cst_78 [1] : vector<8x8xf32> to vector<8xf32>
    %238 = vector.shape_cast %237 : vector<8xf32> to vector<8x1xf32>
    %239 = tpu.reciprocal %238 {approx = true} : vector<8x1xf32> -> vector<8x1xf32>
    %240 = vector.broadcast %239 : vector<8x1xf32> to vector<8x8xf32>
    %241 = arith.mulf %236, %240 : vector<8x8xf32>
    %242 = arith.truncf %241 : vector<8x8xf32> to vector<8x8xbf16>
    %cst_79 = arith.constant dense<0.000000e+00> : vector<8x8xf32>
    %243 = tpu.matmul %242, %230, %cst_79 {dimension_numbers = #tpu.dot_dimension_numbers<[1], [0], [0], [1], [0, 0, 1, 1], [], []>} : vector<8x8xbf16>, vector<8x8xbf16>, vector<8x8xf32> -> vector<8x8xf32>
    %c16_80 = arith.constant 16 : index
    %c24_81 = arith.constant 24 : index
    %244 = vector.load %arg15[%c16_80, %c24_81] : memref<32x32xf32, #tpu.memory_space<vmem>>, vector<8x8xf32>
    tpu.vector_store %arg15[%c16_80, %c24_81], %243 {strides = array<i32>} : memref<32x32xf32, #tpu.memory_space<vmem>>, vector<8x8xf32>,
    %245 = vector.extract_strided_slice %34 {offsets = [24, 0], sizes = [8, 96], strides = [1, 1]} : vector<32x96xf32> to vector<8x96xf32>
    %246 = arith.truncf %245 : vector<8x96xf32> to vector<8x96xbf16>
    %247 = vector.extract_strided_slice %246 {offsets = [0, 0], sizes = [8, 8], strides = [1, 1]} : vector<8x96xbf16> to vector<8x8xbf16>
    %248 = vector.extract_strided_slice %246 {offsets = [0, 32], sizes = [8, 8], strides = [1, 1]} : vector<8x96xbf16> to vector<8x8xbf16>
    %249 = vector.extract_strided_slice %246 {offsets = [0, 64], sizes = [8, 8], strides = [1, 1]} : vector<8x96xbf16> to vector<8x8xbf16>
    %cst_82 = arith.constant dense<0.000000e+00> : vector<8x8xf32>
    %250 = tpu.matmul %247, %248, %cst_82 {dimension_numbers = #tpu.dot_dimension_numbers<[1], [1], [0], [0], [0, 0, 1, 0], [], []>} : vector<8x8xbf16>, vector<8x8xbf16>, vector<8x8xf32> -> vector<8x8xf32>
    %cst_83 = arith.constant dense<0xFF800000> : vector<8xf32>
    %251 = vector.multi_reduction <maximumf>, %250, %cst_83 [1] : vector<8x8xf32> to vector<8xf32>
    %252 = vector.shape_cast %251 : vector<8xf32> to vector<8x1xf32>
    %253 = vector.broadcast %252 : vector<8x1xf32> to vector<8x8xf32>
    %254 = arith.subf %250, %253 : vector<8x8xf32>
    %255 = math.exp %254 : vector<8x8xf32>
    %cst_84 = arith.constant dense<0.000000e+00> : vector<8xf32>
    %256 = vector.multi_reduction <add>, %255, %cst_84 [1] : vector<8x8xf32> to vector<8xf32>
    %257 = vector.shape_cast %256 : vector<8xf32> to vector<8x1xf32>
    %258 = tpu.reciprocal %257 {approx = true} : vector<8x1xf32> -> vector<8x1xf32>
    %259 = vector.broadcast %258 : vector<8x1xf32> to vector<8x8xf32>
    %260 = arith.mulf %255, %259 : vector<8x8xf32>
    %261 = arith.truncf %260 : vector<8x8xf32> to vector<8x8xbf16>
    %cst_85 = arith.constant dense<0.000000e+00> : vector<8x8xf32>
    %262 = tpu.matmul %261, %249, %cst_85 {dimension_numbers = #tpu.dot_dimension_numbers<[1], [0], [0], [1], [0, 0, 1, 1], [], []>} : vector<8x8xbf16>, vector<8x8xbf16>, vector<8x8xf32> -> vector<8x8xf32>
    %c24_86 = arith.constant 24 : index
    %c0_87 = arith.constant 0 : index
    %263 = vector.load %arg15[%c24_86, %c0_87] : memref<32x32xf32, #tpu.memory_space<vmem>>, vector<8x8xf32>
    tpu.vector_store %arg15[%c24_86, %c0_87], %262 {strides = array<i32>} : memref<32x32xf32, #tpu.memory_space<vmem>>, vector<8x8xf32>,
    %264 = vector.extract_strided_slice %246 {offsets = [0, 8], sizes = [8, 8], strides = [1, 1]} : vector<8x96xbf16> to vector<8x8xbf16>
    %265 = vector.extract_strided_slice %246 {offsets = [0, 40], sizes = [8, 8], strides = [1, 1]} : vector<8x96xbf16> to vector<8x8xbf16>
    %266 = vector.extract_strided_slice %246 {offsets = [0, 72], sizes = [8, 8], strides = [1, 1]} : vector<8x96xbf16> to vector<8x8xbf16>
    %cst_88 = arith.constant dense<0.000000e+00> : vector<8x8xf32>
    %267 = tpu.matmul %264, %265, %cst_88 {dimension_numbers = #tpu.dot_dimension_numbers<[1], [1], [0], [0], [0, 0, 1, 0], [], []>} : vector<8x8xbf16>, vector<8x8xbf16>, vector<8x8xf32> -> vector<8x8xf32>
    %cst_89 = arith.constant dense<0xFF800000> : vector<8xf32>
    %268 = vector.multi_reduction <maximumf>, %267, %cst_89 [1] : vector<8x8xf32> to vector<8xf32>
    %269 = vector.shape_cast %268 : vector<8xf32> to vector<8x1xf32>
    %270 = vector.broadcast %269 : vector<8x1xf32> to vector<8x8xf32>
    %271 = arith.subf %267, %270 : vector<8x8xf32>
    %272 = math.exp %271 : vector<8x8xf32>
    %cst_90 = arith.constant dense<0.000000e+00> : vector<8xf32>
    %273 = vector.multi_reduction <add>, %272, %cst_90 [1] : vector<8x8xf32> to vector<8xf32>
    %274 = vector.shape_cast %273 : vector<8xf32> to vector<8x1xf32>
    %275 = tpu.reciprocal %274 {approx = true} : vector<8x1xf32> -> vector<8x1xf32>
    %276 = vector.broadcast %275 : vector<8x1xf32> to vector<8x8xf32>
    %277 = arith.mulf %272, %276 : vector<8x8xf32>
    %278 = arith.truncf %277 : vector<8x8xf32> to vector<8x8xbf16>
    %cst_91 = arith.constant dense<0.000000e+00> : vector<8x8xf32>
    %279 = tpu.matmul %278, %266, %cst_91 {dimension_numbers = #tpu.dot_dimension_numbers<[1], [0], [0], [1], [0, 0, 1, 1], [], []>} : vector<8x8xbf16>, vector<8x8xbf16>, vector<8x8xf32> -> vector<8x8xf32>
    %c24_92 = arith.constant 24 : index
    %c8_93 = arith.constant 8 : index
    %280 = vector.load %arg15[%c24_92, %c8_93] : memref<32x32xf32, #tpu.memory_space<vmem>>, vector<8x8xf32>
    tpu.vector_store %arg15[%c24_92, %c8_93], %279 {strides = array<i32>} : memref<32x32xf32, #tpu.memory_space<vmem>>, vector<8x8xf32>,
    %281 = vector.extract_strided_slice %246 {offsets = [0, 16], sizes = [8, 8], strides = [1, 1]} : vector<8x96xbf16> to vector<8x8xbf16>
    %282 = vector.extract_strided_slice %246 {offsets = [0, 48], sizes = [8, 8], strides = [1, 1]} : vector<8x96xbf16> to vector<8x8xbf16>
    %283 = vector.extract_strided_slice %246 {offsets = [0, 80], sizes = [8, 8], strides = [1, 1]} : vector<8x96xbf16> to vector<8x8xbf16>
    %cst_94 = arith.constant dense<0.000000e+00> : vector<8x8xf32>
    %284 = tpu.matmul %281, %282, %cst_94 {dimension_numbers = #tpu.dot_dimension_numbers<[1], [1], [0], [0], [0, 0, 1, 0], [], []>} : vector<8x8xbf16>, vector<8x8xbf16>, vector<8x8xf32> -> vector<8x8xf32>
    %cst_95 = arith.constant dense<0xFF800000> : vector<8xf32>
    %285 = vector.multi_reduction <maximumf>, %284, %cst_95 [1] : vector<8x8xf32> to vector<8xf32>
    %286 = vector.shape_cast %285 : vector<8xf32> to vector<8x1xf32>
    %287 = vector.broadcast %286 : vector<8x1xf32> to vector<8x8xf32>
    %288 = arith.subf %284, %287 : vector<8x8xf32>
    %289 = math.exp %288 : vector<8x8xf32>
    %cst_96 = arith.constant dense<0.000000e+00> : vector<8xf32>
    %290 = vector.multi_reduction <add>, %289, %cst_96 [1] : vector<8x8xf32> to vector<8xf32>
    %291 = vector.shape_cast %290 : vector<8xf32> to vector<8x1xf32>
    %292 = tpu.reciprocal %291 {approx = true} : vector<8x1xf32> -> vector<8x1xf32>
    %293 = vector.broadcast %292 : vector<8x1xf32> to vector<8x8xf32>
    %294 = arith.mulf %289, %293 : vector<8x8xf32>
    %295 = arith.truncf %294 : vector<8x8xf32> to vector<8x8xbf16>
    %cst_97 = arith.constant dense<0.000000e+00> : vector<8x8xf32>
    %296 = tpu.matmul %295, %283, %cst_97 {dimension_numbers = #tpu.dot_dimension_numbers<[1], [0], [0], [1], [0, 0, 1, 1], [], []>} : vector<8x8xbf16>, vector<8x8xbf16>, vector<8x8xf32> -> vector<8x8xf32>
    %c24_98 = arith.constant 24 : index
    %c16_99 = arith.constant 16 : index
    %297 = vector.load %arg15[%c24_98, %c16_99] : memref<32x32xf32, #tpu.memory_space<vmem>>, vector<8x8xf32>
    tpu.vector_store %arg15[%c24_98, %c16_99], %296 {strides = array<i32>} : memref<32x32xf32, #tpu.memory_space<vmem>>, vector<8x8xf32>,
    %298 = vector.extract_strided_slice %246 {offsets = [0, 24], sizes = [8, 8], strides = [1, 1]} : vector<8x96xbf16> to vector<8x8xbf16>
    %299 = vector.extract_strided_slice %246 {offsets = [0, 56], sizes = [8, 8], strides = [1, 1]} : vector<8x96xbf16> to vector<8x8xbf16>
    %300 = vector.extract_strided_slice %246 {offsets = [0, 88], sizes = [8, 8], strides = [1, 1]} : vector<8x96xbf16> to vector<8x8xbf16>
    %cst_100 = arith.constant dense<0.000000e+00> : vector<8x8xf32>
    %301 = tpu.matmul %298, %299, %cst_100 {dimension_numbers = #tpu.dot_dimension_numbers<[1], [1], [0], [0], [0, 0, 1, 0], [], []>} : vector<8x8xbf16>, vector<8x8xbf16>, vector<8x8xf32> -> vector<8x8xf32>
    %cst_101 = arith.constant dense<0xFF800000> : vector<8xf32>
    %302 = vector.multi_reduction <maximumf>, %301, %cst_101 [1] : vector<8x8xf32> to vector<8xf32>
    %303 = vector.shape_cast %302 : vector<8xf32> to vector<8x1xf32>
    %304 = vector.broadcast %303 : vector<8x1xf32> to vector<8x8xf32>
    %305 = arith.subf %301, %304 : vector<8x8xf32>
    %306 = math.exp %305 : vector<8x8xf32>
    %cst_102 = arith.constant dense<0.000000e+00> : vector<8xf32>
    %307 = vector.multi_reduction <add>, %306, %cst_102 [1] : vector<8x8xf32> to vector<8xf32>
    %308 = vector.shape_cast %307 : vector<8xf32> to vector<8x1xf32>
    %309 = tpu.reciprocal %308 {approx = true} : vector<8x1xf32> -> vector<8x1xf32>
    %310 = vector.broadcast %309 : vector<8x1xf32> to vector<8x8xf32>
    %311 = arith.mulf %306, %310 : vector<8x8xf32>
    %312 = arith.truncf %311 : vector<8x8xf32> to vector<8x8xbf16>
    %cst_103 = arith.constant dense<0.000000e+00> : vector<8x8xf32>
    %313 = tpu.matmul %312, %300, %cst_103 {dimension_numbers = #tpu.dot_dimension_numbers<[1], [0], [0], [1], [0, 0, 1, 1], [], []>} : vector<8x8xbf16>, vector<8x8xbf16>, vector<8x8xf32> -> vector<8x8xf32>
    %c24_104 = arith.constant 24 : index
    %c24_105 = arith.constant 24 : index
    %314 = vector.load %arg15[%c24_104, %c24_105] : memref<32x32xf32, #tpu.memory_space<vmem>>, vector<8x8xf32>
    tpu.vector_store %arg15[%c24_104, %c24_105], %313 {strides = array<i32>} : memref<32x32xf32, #tpu.memory_space<vmem>>, vector<8x8xf32>,
    %c0_106 = arith.constant 0 : index
    %c0_107 = arith.constant 0 : index
    %315 = vector.load %arg15[%c0_106, %c0_107] : memref<32x32xf32, #tpu.memory_space<vmem>>, vector<32x32xf32>
    %316 = arith.truncf %315 : vector<32x32xf32> to vector<32x32xbf16>
    %c0_108 = arith.constant 0 : index
    %c0_109 = arith.constant 0 : index
    %317 = vector.load %arg5[%c0_108, %c0_109] : memref<32x32xbf16, #tpu.memory_space<vmem>>, vector<32x32xbf16>
    %cst_110 = arith.constant dense<0.000000e+00> : vector<32x32xf32>
    %318 = tpu.matmul %316, %317, %cst_110 {dimension_numbers = #tpu.dot_dimension_numbers<[1], [0], [0], [1], [0, 0, 1, 1], [], []>} : vector<32x32xbf16>, vector<32x32xbf16>, vector<32x32xf32> -> vector<32x32xf32>
    %319 = arith.addf %1, %318 : vector<32x32xf32>
    %c0_111 = arith.constant 0 : index
    %c0_112 = arith.constant 0 : index
    %320 = vector.load %arg6[%c0_111, %c0_112] : memref<1x32xf32, #tpu.memory_space<vmem>>, vector<1x32xf32>
    %321 = vector.broadcast %320 : vector<1x32xf32> to vector<32x32xf32>
    %322 = arith.addf %319, %321 : vector<32x32xf32>
    %c0_113 = arith.constant 0 : index
    %c0_114 = arith.constant 0 : index
    %323 = vector.load %arg7[%c0_113, %c0_114] : memref<2x32xf32, #tpu.memory_space<vmem>>, vector<2x32xf32>
    %cst_115 = arith.constant dense<0.000000e+00> : vector<32xf32>
    %324 = vector.multi_reduction <add>, %322, %cst_115 [1] : vector<32x32xf32> to vector<32xf32>
    %325 = vector.shape_cast %324 : vector<32xf32> to vector<32x1xf32>
    %cst_116 = arith.constant 3.200000e+01 : f32
    %326 = vector.broadcast %cst_116 : f32 to vector<32x1xf32>
    %327 = arith.divf %325, %326 : vector<32x1xf32>
    %328 = vector.broadcast %327 : vector<32x1xf32> to vector<32x32xf32>
    %329 = arith.subf %322, %328 : vector<32x32xf32>
    %330 = vector.broadcast %327 : vector<32x1xf32> to vector<32x32xf32>
    %331 = arith.subf %322, %330 : vector<32x32xf32>
    %332 = arith.mulf %329, %331 : vector<32x32xf32>
    %cst_117 = arith.constant dense<0.000000e+00> : vector<32xf32>
    %333 = vector.multi_reduction <add>, %332, %cst_117 [1] : vector<32x32xf32> to vector<32xf32>
    %334 = vector.shape_cast %333 : vector<32xf32> to vector<32x1xf32>
    %cst_118 = arith.constant 3.200000e+01 : f32
    %335 = vector.broadcast %cst_118 : f32 to vector<32x1xf32>
    %336 = arith.divf %334, %335 : vector<32x1xf32>
    %337 = vector.broadcast %327 : vector<32x1xf32> to vector<32x32xf32>
    %338 = arith.subf %322, %337 : vector<32x32xf32>
    %cst_119 = arith.constant 9.99999974E-6 : f32
    %339 = vector.broadcast %cst_119 : f32 to vector<32x1xf32>
    %340 = arith.addf %336, %339 : vector<32x1xf32>
    %341 = math.rsqrt %340 : vector<32x1xf32>
    %342 = vector.broadcast %341 : vector<32x1xf32> to vector<32x32xf32>
    %343 = arith.mulf %338, %342 : vector<32x32xf32>
    %344 = vector.extract_strided_slice %323 {offsets = [0, 0], sizes = [1, 32], strides = [1, 1]} : vector<2x32xf32> to vector<1x32xf32>
    %345 = vector.broadcast %344 : vector<1x32xf32> to vector<32x32xf32>
    %346 = arith.mulf %343, %345 : vector<32x32xf32>
    %347 = vector.extract_strided_slice %323 {offsets = [1, 0], sizes = [1, 32], strides = [1, 1]} : vector<2x32xf32> to vector<1x32xf32>
    %348 = vector.broadcast %347 : vector<1x32xf32> to vector<32x32xf32>
    %349 = arith.addf %346, %348 : vector<32x32xf32>
    %350 = arith.truncf %349 : vector<32x32xf32> to vector<32x32xbf16>
    %c0_120 = arith.constant 0 : index
    %c0_121 = arith.constant 0 : index
    %351 = vector.load %arg8[%c0_120, %c0_121] : memref<32x64xbf16, #tpu.memory_space<vmem>>, vector<32x64xbf16>
    %cst_122 = arith.constant dense<0.000000e+00> : vector<32x64xf32>
    %352 = tpu.matmul %350, %351, %cst_122 {dimension_numbers = #tpu.dot_dimension_numbers<[1], [0], [0], [1], [0, 0, 1, 1], [], []>} : vector<32x32xbf16>, vector<32x64xbf16>, vector<32x64xf32> -> vector<32x64xf32>
    %c0_123 = arith.constant 0 : index
    %c0_124 = arith.constant 0 : index
    %353 = vector.load %arg9[%c0_123, %c0_124] : memref<1x64xf32, #tpu.memory_space<vmem>>, vector<1x64xf32>
    %354 = vector.broadcast %353 : vector<1x64xf32> to vector<32x64xf32>
    %355 = arith.addf %352, %354 : vector<32x64xf32>
    %356 = arith.mulf %355, %355 : vector<32x64xf32>
    %357 = arith.mulf %355, %356 : vector<32x64xf32>
    %cst_125 = arith.constant 4.471500e-02 : f32
    %358 = vector.broadcast %cst_125 : f32 to vector<32x64xf32>
    %359 = arith.mulf %358, %357 : vector<32x64xf32>
    %360 = arith.addf %355, %359 : vector<32x64xf32>
    %cst_126 = arith.constant 0.797884583 : f32
    %361 = vector.broadcast %cst_126 : f32 to vector<32x64xf32>
    %362 = arith.mulf %361, %360 : vector<32x64xf32>
    %363 = math.tanh %362 : vector<32x64xf32>
    %cst_127 = arith.constant 1.000000e+00 : f32
    %364 = vector.broadcast %cst_127 : f32 to vector<32x64xf32>
    %365 = arith.addf %364, %363 : vector<32x64xf32>
    %cst_128 = arith.constant 5.000000e-01 : f32
    %366 = vector.broadcast %cst_128 : f32 to vector<32x64xf32>
    %367 = arith.mulf %366, %365 : vector<32x64xf32>
    %368 = arith.mulf %355, %367 : vector<32x64xf32>
    %369 = arith.truncf %368 : vector<32x64xf32> to vector<32x64xbf16>
    %c0_129 = arith.constant 0 : index
    %c0_130 = arith.constant 0 : index
    %370 = vector.load %arg10[%c0_129, %c0_130] : memref<64x32xbf16, #tpu.memory_space<vmem>>, vector<64x32xbf16>
    %cst_131 = arith.constant dense<0.000000e+00> : vector<32x32xf32>
    %371 = tpu.matmul %369, %370, %cst_131 {dimension_numbers = #tpu.dot_dimension_numbers<[1], [0], [0], [1], [0, 0, 1, 1], [], []>} : vector<32x64xbf16>, vector<64x32xbf16>, vector<32x32xf32> -> vector<32x32xf32>
    %c0_132 = arith.constant 0 : index
    %c0_133 = arith.constant 0 : index
    %372 = vector.load %arg11[%c0_132, %c0_133] : memref<1x32xf32, #tpu.memory_space<vmem>>, vector<1x32xf32>
    %373 = vector.broadcast %372 : vector<1x32xf32> to vector<32x32xf32>
    %374 = arith.addf %371, %373 : vector<32x32xf32>
    %375 = arith.addf %322, %374 : vector<32x32xf32>
    %376 = arith.truncf %375 : vector<32x32xf32> to vector<32x32xbf16>
    %c0_134 = arith.constant 0 : index
    %c0_135 = arith.constant 0 : index
    %377 = vector.load %arg12[%c0_134, %c0_135] : memref<32x128xbf16, #tpu.memory_space<vmem>>, vector<32x128xbf16>
    %cst_136 = arith.constant dense<0.000000e+00> : vector<32x128xf32>
    %378 = tpu.matmul %376, %377, %cst_136 {dimension_numbers = #tpu.dot_dimension_numbers<[1], [0], [0], [1], [0, 0, 1, 1], [], []>} : vector<32x32xbf16>, vector<32x128xbf16>, vector<32x128xf32> -> vector<32x128xf32>
    %c0_137 = arith.constant 0 : index
    %c0_138 = arith.constant 0 : index
    %379 = vector.load %arg13[%c0_137, %c0_138] : memref<1x128xf32, #tpu.memory_space<vmem>>, vector<1x128xf32>
    %380 = vector.broadcast %379 : vector<1x128xf32> to vector<32x128xf32>
    %381 = arith.addf %378, %380 : vector<32x128xf32>
    %382 = vector.shape_cast %381 : vector<32x128xf32> to vector<4x8x128xf32>
    %c0_139 = arith.constant 0 : index
    %c0_140 = arith.constant 0 : index
    %c0_141 = arith.constant 0 : index
    %383 = vector.load %arg14[%c0_139, %c0_140, %c0_141] : memref<4x8x128xf32, #tpu.memory_space<vmem>>, vector<4x8x128xf32>
    tpu.vector_store %arg14[%c0_139, %c0_140, %c0_141], %382 {strides = array<i32>} : memref<4x8x128xf32, #tpu.memory_space<vmem>>, vector<4x8x128xf32>,
    return
  }
  func.func @transform_0(%arg0: i32) -> (i32, i32, i32) {
    %c0_i32 = arith.constant 0 : i32
    %c0_i32_0 = arith.constant 0 : i32
    %c0_i32_1 = arith.constant 0 : i32
    return %arg0, %c0_i32, %c0_i32_0 : i32, i32, i32
  }
  func.func @transform_1(%arg0: i32) -> (i32, i32) {
    %c0_i32 = arith.constant 0 : i32
    %c0_i32_0 = arith.constant 0 : i32
    %c0_i32_1 = arith.constant 0 : i32
    return %c0_i32, %c0_i32_0 : i32, i32
  }
  func.func @transform_2(%arg0: i32) -> (i32, i32) {
    %c0_i32 = arith.constant 0 : i32
    %c0_i32_0 = arith.constant 0 : i32
    %c0_i32_1 = arith.constant 0 : i32
    return %c0_i32, %c0_i32_0 : i32, i32
  }
  func.func @transform_3(%arg0: i32) -> (i32, i32) {
    %c0_i32 = arith.constant 0 : i32
    %c0_i32_0 = arith.constant 0 : i32
    %c0_i32_1 = arith.constant 0 : i32
    return %c0_i32, %c0_i32_0 : i32, i32
  }
  func.func @transform_4(%arg0: i32) -> (i32, i32) {
    %c0_i32 = arith.constant 0 : i32
    %c0_i32_0 = arith.constant 0 : i32
    %c0_i32_1 = arith.constant 0 : i32
    return %c0_i32, %c0_i32_0 : i32, i32
  }
  func.func @transform_5(%arg0: i32) -> (i32, i32) {
    %c0_i32 = arith.constant 0 : i32
    %c0_i32_0 = arith.constant 0 : i32
    %c0_i32_1 = arith.constant 0 : i32
    return %c0_i32, %c0_i32_0 : i32, i32
  }
  func.func @transform_6(%arg0: i32) -> (i32, i32) {
    %c0_i32 = arith.constant 0 : i32
    %c0_i32_0 = arith.constant 0 : i32
    %c0_i32_1 = arith.constant 0 : i32
    return %c0_i32, %c0_i32_0 : i32, i32
  }
  func.func @transform_7(%arg0: i32) -> (i32, i32) {
    %c0_i32 = arith.constant 0 : i32
    %c0_i32_0 = arith.constant 0 : i32
    %c0_i32_1 = arith.constant 0 : i32
    return %c0_i32, %c0_i32_0 : i32, i32
  }
  func.func @transform_8(%arg0: i32) -> (i32, i32) {
    %c0_i32 = arith.constant 0 : i32
    %c0_i32_0 = arith.constant 0 : i32
    %c0_i32_1 = arith.constant 0 : i32
    return %c0_i32, %c0_i32_0 : i32, i32
  }
  func.func @transform_9(%arg0: i32) -> (i32, i32) {
    %c0_i32 = arith.constant 0 : i32
    %c0_i32_0 = arith.constant 0 : i32
    %c0_i32_1 = arith.constant 0 : i32
    return %c0_i32, %c0_i32_0 : i32, i32
  }
  func.func @transform_10(%arg0: i32) -> (i32, i32) {
    %c0_i32 = arith.constant 0 : i32
    %c0_i32_0 = arith.constant 0 : i32
    %c0_i32_1 = arith.constant 0 : i32
    return %c0_i32, %c0_i32_0 : i32, i32
  }
  func.func @transform_11(%arg0: i32) -> (i32, i32) {
    %c0_i32 = arith.constant 0 : i32
    %c0_i32_0 = arith.constant 0 : i32
    %c0_i32_1 = arith.constant 0 : i32
    return %c0_i32, %c0_i32_0 : i32, i32
  }
  func.func @transform_12(%arg0: i32) -> (i32, i32) {
    %c0_i32 = arith.constant 0 : i32
    %c0_i32_0 = arith.constant 0 : i32
    %c0_i32_1 = arith.constant 0 : i32
    return %c0_i32, %c0_i32_0 : i32, i32
  }
  func.func @transform_13(%arg0: i32) -> (i32, i32, i32) {
    %c0_i32 = arith.constant 0 : i32
    %c0_i32_0 = arith.constant 0 : i32
    %c0_i32_1 = arith.constant 0 : i32
    return %arg0, %c0_i32, %c0_i32_0 : i32, i32, i32
  }
}

</mosaic_0001>

<bundles_post_ra>
// kernel: tpu_custom_call.1
= control target key start
LH: loop header
LB: loop body
LE: loop exit
PB: predicated region body
PF: predicated region fallthrough
CT: control target
= control target key end

     0   :  { %18 = vsyncpa [#allocation4], 0  ;;  %s3995_s0 = inlined_call_operand.vmem [shape: f32[4,8,32], index: 0, kind: input, shape index: {}]   ;;  %s3996_s1 = inlined_call_operand.vmem [shape: f32[2,32], index: 1, kind: input, shape index: {}]   ;;  %s3997_s2 = inlined_call_operand.vmem [shape: bf16[32,96], index: 2, kind: input, shape index: {}]   ;;  %s3998_s3 = inlined_call_operand.hbm [shape: f32[1,96], index: 3, kind: input, shape index: {}]   ;;  %s3999_s4 = inlined_call_operand.hbm [shape: bf16[32,32], index: 4, kind: input, shape index: {}]   ;;  %s4000_s5 = inlined_call_operand.hbm [shape: f32[1,32], index: 5, kind: input, shape index: {}]   ;;  %s4001_s6 = inlined_call_operand.hbm [shape: f32[2,32], index: 6, kind: input, shape index: {}]   ;;  %s4002_s7 = inlined_call_operand.hbm [shape: bf16[32,64], index: 7, kind: input, shape index: {}]   ;;  %s4003_s8 = inlined_call_operand.hbm [shape: f32[1,64], index: 8, kind: input, shape index: {}]   ;;  %s4004_s9 = inlined_call_operand.vmem [shape: bf16[64,32], index: 9, kind: input, shape index: {}]   ;;  %s4005_s10 = inlined_call_operand.vmem [shape: f32[1,32], index: 10, kind: input, shape index: {}]   ;;  %s4006_s11 = inlined_call_operand.vmem [shape: bf16[32,128], index: 11, kind: input, shape index: {}]   ;;  %s4007_s12 = inlined_call_operand.vmem [shape: f32[1,128], index: 12, kind: input, shape index: {}]   ;;  %s4008_s13 = inlined_call_operand.hbm [shape: f32[4,8,128], index: 13, kind: output, shape index: {}]  }
   0x1   :  { %19 = vsyncpa [#allocation7], 0 }
   0x2   :  { %20 = vsyncpa [#allocation10], 0 }
   0x3   :  { %21 = vsyncpa [#allocation13], 0 }
   0x4   :  { %22 = vsyncpa [#allocation5], 0  ;;  %s3260_s25 = smov [#allocation6]   ;;  %s3096_s29 = scalar_lea.hbm %s3999_s4, 256 }
   0x5   :  { %s44_s26 = sshll.u32 %s3260_s25, 4  ;;  %p3097_p0 = scmp.ne.s32.totalorder %s3999_s4, %s3096_s29  ;;  %s45_s26 = int_to_ptr.vmem [resolvable:$true] %s44_s26 }
   0x6   :  { %p3100_p1 = scmp.lt.u32.totalorder %s3096_s29, %s3999_s4 }
   0x8   :  { %p3102_p2 = pnand %p3100_p1, %p3097_p0 }
   0xa   :  { %3105 = shalt.err (!%p3102_p2)
}
   0xb   :  { %s3106_s17 = scalar_lea.vmem %s45_s26, 256  ;;  %p3111_p4 = scmp.lt.s32.totalorder %s45_s26, %s45_s26 }
   0xc   :  { %p3107_p3 = scmp.ne.s32.totalorder %s45_s26, %s3106_s17  ;;  %p3112_p5 = scmp.lt.s32.totalorder %s3106_s17, %s3106_s17 }
   0xe   :  { %p3113_p6 = por %p3112_p5, %p3111_p4 }
  0x10   :  { %p3114_p7 = pnand %p3113_p6, %p3107_p3 }
  0x12   :  { %3117 = shalt.err (!%p3114_p7)
}
  0x13   :  { %s3261_s18 = smov 64   ;;  %s3262_s19 = smov 4  }
  0x14   :  { %50 = dma.hbm_to_vmem [thread:$0]  %s3999_s4, 256, %s45_s26, [#allocation7], %s3261_s18, %s3261_s18, %s3262_s19  }
  0x15   :  { %s3263_s22 = smov [#allocation9]   ;;  %s3264_s24 = smov [#allocation3]  }
  0x16   :  { %s67_s23 = sshll.u32 %s3263_s22, 4  ;;  %s35_s25 = sshll.u32 %s3264_s24, 4  ;;  %s68_s23 = int_to_ptr.vmem [resolvable:$true] %s67_s23  ;;  %s36_s25 = int_to_ptr.vmem [resolvable:$true] %s35_s25 }
  0x17   :  { %s3118_s29 = scalar_lea.hbm %s4001_s6, 32 }
  0x18   :  { %p3119_p8 = scmp.ne.s32.totalorder %s4001_s6, %s3118_s29  ;;  %p3122_p9 = scmp.lt.u32.totalorder %s3118_s29, %s4001_s6 }
  0x1a   :  { %p3124_p10 = pnand %p3122_p9, %p3119_p8 }
  0x1c   :  { %3127 = shalt.err (!%p3124_p10)
}
  0x1d   :  { %s3128_s4 = scalar_lea.vmem %s68_s23, 32  ;;  %p3133_p12 = scmp.lt.s32.totalorder %s68_s23, %s68_s23 }
  0x1e   :  { %p3129_p11 = scmp.ne.s32.totalorder %s68_s23, %s3128_s4  ;;  %p3134_p13 = scmp.lt.s32.totalorder %s3128_s4, %s3128_s4 }
  0x20   :  { %p3135_p0 = por %p3134_p13, %p3133_p12 }
  0x22   :  { %p3136_p1 = pnand %p3135_p0, %p3129_p11 }
  0x24   :  { %3139 = shalt.err (!%p3136_p1)
}
  0x25   :  { %70 = dma.hbm_to_vmem [thread:$0]  %s4001_s6, 32, %s68_s23, [#allocation10]  }
  0x26   :  { %s3140_s22 = scalar_lea.hbm %s3998_s3, 16 }
  0x27   :  { %p3141_p2 = scmp.ne.s32.totalorder %s3998_s3, %s3140_s22  ;;  %p3144_p3 = scmp.lt.u32.totalorder %s3140_s22, %s3998_s3 }
  0x29   :  { %p3146_p4 = pnand %p3144_p3, %p3141_p2 }
  0x2b   :  { %3149 = shalt.err (!%p3146_p4)
}
  0x2c   :  { %s3150_s30 = scalar_lea.vmem %s36_s25, 16  ;;  %s3154_s14 = scalar_lea.vmem %s36_s25, 32 }
  0x2d   :  { %p3151_p5 = scmp.ne.s32.totalorder %s36_s25, %s3150_s30  ;;  %p3155_p6 = scmp.lt.s32.totalorder %s36_s25, %s36_s25 }
  0x2e   :  { %p3156_p7 = scmp.lt.s32.totalorder %s3154_s14, %s3150_s30 }
  0x30   :  { %p3157_p8 = por %p3156_p7, %p3155_p6 }
  0x32   :  { %p3158_p9 = pnand %p3157_p8, %p3151_p5 }
  0x34   :  { %3161 = shalt.err (!%p3158_p9)
}
  0x35   :  { %38 = dma.hbm_to_vmem [thread:$0]  %s3998_s3, 16, %s36_s25, [#allocation4]  }
  0x36   :  { %s3265_s15 = smov [#allocation8]   ;;  %s3266_s4 = smov [#allocation11]  }
  0x37   :  { %s57_s16 = sshll.u32 %s3265_s15, 4  ;;  %s76_s26 = sshll.u32 %s3266_s4, 4  ;;  %s58_s16 = int_to_ptr.vmem [resolvable:$true] %s57_s16  ;;  %s77_s26 = int_to_ptr.vmem [resolvable:$true] %s76_s26 }
  0x38   :  { %s3162_s21 = scalar_lea.hbm %s4000_s5, 16 }
  0x39   :  { %p3163_p10 = scmp.ne.s32.totalorder %s4000_s5, %s3162_s21  ;;  %p3166_p11 = scmp.lt.u32.totalorder %s3162_s21, %s4000_s5 }
  0x3b   :  { %p3168_p12 = pnand %p3166_p11, %p3163_p10 }
  0x3d   :  { %3171 = shalt.err (!%p3168_p12)
}
  0x3e   :  { %s3172_s3 = scalar_lea.vmem %s58_s16, 16  ;;  %s3176_s25 = scalar_lea.vmem %s58_s16, 32 }
  0x3f   :  { %p3173_p13 = scmp.ne.s32.totalorder %s58_s16, %s3172_s3  ;;  %p3177_p0 = scmp.lt.s32.totalorder %s58_s16, %s58_s16 }
  0x40   :  { %p3178_p1 = scmp.lt.s32.totalorder %s3176_s25, %s3172_s3 }
  0x42   :  { %p3179_p2 = por %p3178_p1, %p3177_p0 }
  0x44   :  { %p3180_p3 = pnand %p3179_p2, %p3173_p13 }
  0x46   :  { %3183 = shalt.err (!%p3180_p3)
}
  0x47   :  { %60 = dma.hbm_to_vmem [thread:$0]  %s4000_s5, 16, %s58_s16, [#allocation7]  }
  0x48   :  { %s3184_s23 = scalar_lea.hbm %s4002_s7, 256 }
  0x49   :  { %p3185_p4 = scmp.ne.s32.totalorder %s4002_s7, %s3184_s23  ;;  %p3188_p5 = scmp.lt.u32.totalorder %s3184_s23, %s4002_s7 }
  0x4b   :  { %p3190_p6 = pnand %p3188_p5, %p3185_p4 }
  0x4d   :  { %3193 = shalt.err (!%p3190_p6)
}
  0x4e   :  { %s3194_s21 = scalar_lea.vmem %s77_s26, 256  ;;  %p3199_p8 = scmp.lt.s32.totalorder %s77_s26, %s77_s26 }
  0x4f   :  { %p3195_p7 = scmp.ne.s32.totalorder %s77_s26, %s3194_s21  ;;  %p3200_p9 = scmp.lt.s32.totalorder %s3194_s21, %s3194_s21 }
  0x51   :  { %p3201_p10 = por %p3200_p9, %p3199_p8 }
  0x53   :  { %p3202_p11 = pnand %p3201_p10, %p3195_p7 }
  0x55   :  { %3205 = shalt.err (!%p3202_p11)
}
  0x56   :  { %82 = dma.hbm_to_vmem [thread:$0]  %s4002_s7, 256, %s77_s26, [#allocation10], %s3261_s18, %s3261_s18, %s3262_s19  }
  0x57   :  { %s3267_s22 = smov [#allocation12]   ;;  %s3206_s3 = scalar_lea.hbm %s4003_s8, 16 }
  0x58   :  { %s89_s24 = sshll.u32 %s3267_s22, 4  ;;  %p3207_p12 = scmp.ne.s32.totalorder %s4003_s8, %s3206_s3  ;;  %s90_s24 = int_to_ptr.vmem [resolvable:$true] %s89_s24 }
  0x59   :  { %p3210_p13 = scmp.lt.u32.totalorder %s3206_s3, %s4003_s8 }
  0x5b   :  { %p3212_p0 = pnand %p3210_p13, %p3207_p12 }
  0x5d   :  { %3215 = shalt.err (!%p3212_p0)
}
  0x5e   :  { %s3216_s6 = scalar_lea.vmem %s90_s24, 16  ;;  %s3220_s7 = scalar_lea.vmem %s90_s24, 32 }
  0x5f   :  { %p3217_p1 = scmp.ne.s32.totalorder %s90_s24, %s3216_s6  ;;  %p3221_p2 = scmp.lt.s32.totalorder %s90_s24, %s90_s24 }
  0x60   :  { %p3222_p3 = scmp.lt.s32.totalorder %s3220_s7, %s3216_s6 }
  0x62   :  { %p3223_p4 = por %p3222_p3, %p3221_p2 }
  0x64   :  { %p3224_p5 = pnand %p3223_p4, %p3217_p1 }
  0x66   :  { %3227 = shalt.err (!%p3224_p5)
}
  0x67   :  { %92 = dma.hbm_to_vmem [thread:$0]  %s4003_s8, 16, %s90_s24, [#allocation13]  }
  0x68   :  { %3250 = dma.done.wait [#allocation4], 16  }
  0x69   :  { %3251 = vsyncadd [#allocation4], 4294967280 }
  0x6a   :  { %3252 = dma.done.wait [#allocation7], 272  }
  0x6b   :  { %3253 = vsyncadd [#allocation7], 4294967024 }
  0x6c   :  { %3254 = dma.done.wait [#allocation10], 288  }
  0x6d   :  { %3255 = vsyncadd [#allocation10], 4294967008 }
  0x6e   :  { %3256 = dma.done.wait [#allocation13], 16  }
  0x6f   :  { %3257 = vsyncadd [#allocation13], 4294967280  ;;  %vm125_vm0 = vcmask 261120   ;;  %v120_v0 = vld [vmem:[%s3995_s0] sm:$0xff]  ;;  %v122_v1 = vld [vmem:[%s3995_s0 + $0x10] sm:$0xff]  ;;  %v179_v35 = vlaneseq  ;;  %vm3269_vm1 = vmmov 0  }
  0x70   :  { %v121_v2 = vld [vmem:[%s3995_s0 + $0x8] sm:$0xff]  ;;  %v126_v3 = vsel %vm125_vm0, %v120_v0, 0.0  ;;  %v132_v4 = vsel %vm125_vm0, %v122_v1, 0.0  ;;  %v123_v5 = vld [vmem:[%s3995_s0 + $0x18] sm:$0xff]  ;;  %v2992_v28 = vld [vmem:[%s3997_s2] sm:$0xff]   ;;  %s3271_s3 = smov 96  }
  0x71   :  { %127 = vadd.xlane.f32.xlu0 %v126_v3  ;;  %133 = vadd.xlane.f32.xlu1 %v132_v4  ;;  %v129_v6 = vsel %vm125_vm0, %v121_v2, 0.0  ;;  %v135_v7 = vsel %vm125_vm0, %v123_v5, 0.0  ;;  %v2993_v29 = vld [vmem:[%s3997_s2 + $0x8] sm:$0xff]   ;;  %v3459_v41 = vshrl.u32 %v179_v35, 7  ;;  %v124_v45 = vld [vmem:[%s3996_s1] sm:$0x3] }
  0x72   :  { %2731 = vmatprep.subr.bf16.mxu0 %v2992_v28  ;;  %v3268_v3 = vmov 0.0   ;;  %v2586_v4 = vld [vmem:[#allocation3] ss:$0 sm:$0xff]  ;;  %s3270_s1 = smov 88   ;;  %s3272_s25 = smov 120   ;;  %vm279_vm2 = vcmask 64512  }
  0x73   :  { %2732 = vmatpush3.bf16.msra.mxu0 %v2992_v28  ;;  %v181_v44 = vsub.s32 0, %v3459_v41  ;;  %v189_v49 = vsub.s32 1, %v3459_v41  ;;  %2739 = vmatprep.subr.bf16.mxu1 %v3268_v3  ;;  %s3273_s29 = smov 112   ;;  %s3274_s30 = smov 80   ;;  %vm343_vm3 = vcmask 1043456   ;;  %vm502_vm4 = vcmask 130112  }
  0x74   :  { %2733 = vmatprep.subr.bf16.mxu0 %v2993_v29  ;;  %2741 = vmatprep.mubr.msk.bf16.mxu1 %vm3269_vm1, %v3268_v3  ;;  %s3275_s14 = smov 104   ;;  %s3276_s6 = smov 72   ;;  %vm618_vm5 = vcmask 195712   ;;  %vm734_vm6 = vcmask 261312   ;;  %vm2422_vm7 = vcmask 523264  }
  0x75   :  { %130 = vadd.xlane.f32.xlu0 %v129_v6  ;;  %136 = vadd.xlane.f32.xlu1 %v135_v7  ;;  %v182_v48 = vrot.slane %v124_v45, %v181_v44  ;;  %v190_v54 = vrot.slane %v124_v45, %v189_v49  ;;  %s3277_s7 = smov 56   ;;  %s3278_s19 = smov 48  }
  0x76   :  { %s3279_s26 = smov 40   ;;  %s3281_s23 = smov 16  }
  0x77   :  { %2734 = vmatpush3.bf16.msra.mxu0 %v2993_v29  ;;  %s3282_s15 = smov 24  }
  0x78   :  { %2745 = vmatprep.subr.bf16.mxu0 %v3268_v3 }
  0xfe   :  { %v128_v8 = vpop.xlane.xlu0 %127  ;;  %v134_v9 = vpop.xlane.xlu1 %133 }
  0xff   :  { %v139_v10 = vmul.f32 0.03125, %v128_v8  ;;  %v141_v11 = vmul.f32 0.03125, %v134_v9 }
 0x101   :  { %v143_v12 = vsub.f32 %v120_v0, %v139_v10  ;;  %v145_v13 = vsub.f32 %v122_v1, %v141_v11 }
 0x102   :  { %v131_v14 = vpop.xlane.xlu0 %130  ;;  %v137_v15 = vpop.xlane.xlu1 %136 }
 0x103   :  { %v140_v16 = vmul.f32 0.03125, %v131_v14  ;;  %v142_v17 = vmul.f32 0.03125, %v137_v15  ;;  %v147_v18 = vmul.f32 %v143_v12, %v143_v12  ;;  %v149_v19 = vmul.f32 %v145_v13, %v145_v13 }
 0x105   :  { %v144_v20 = vsub.f32 %v121_v2, %v140_v16  ;;  %v146_v21 = vsub.f32 %v123_v5, %v142_v17  ;;  %v151_v22 = vsel %vm125_vm0, %v147_v18, 0.0  ;;  %v157_v23 = vsel %vm125_vm0, %v149_v19, 0.0 }
 0x106   :  { %152 = vadd.xlane.f32.xlu0 %v151_v22 }
 0x107   :  { %v148_v24 = vmul.f32 %v144_v20, %v144_v20  ;;  %v150_v25 = vmul.f32 %v146_v21, %v146_v21 }
 0x109   :  { %v154_v26 = vsel %vm125_vm0, %v148_v24, 0.0  ;;  %v160_v27 = vsel %vm125_vm0, %v150_v25, 0.0 }
 0x10a   :  { %158 = vadd.xlane.f32.xlu0 %v157_v23  ;;  %155 = vadd.xlane.f32.xlu1 %v154_v26 }
 0x10e   :  { %161 = vadd.xlane.f32.xlu1 %v160_v27 }
 0x193   :  { %v153_v30 = vpop.xlane.xlu0 %152 }
 0x194   :  { %v163_v31 = vmul.f32 0.03125, %v153_v30 }
 0x196   :  { %v167_v32 = vadd.f32 1e-05, %v163_v31 }
 0x197   :  { %v156_v33 = vpop.xlane.xlu1 %155  ;;  %v159_v34 = vpop.xlane.xlu0 %158 }
 0x198   :  { %3004 = vrsqrt.f32 %v167_v32  ;;  %v164_v36 = vmul.f32 0.03125, %v156_v33  ;;  %v165_v37 = vmul.f32 0.03125, %v159_v34 }
 0x19a   :  { %v168_v38 = vadd.f32 1e-05, %v164_v36  ;;  %v169_v39 = vadd.f32 1e-05, %v165_v37 }
 0x19b   :  { %v162_v40 = vpop.xlane.xlu1 %161 }
 0x19c   :  { %3006 = vrsqrt.f32 %v168_v38  ;;  %v166_v42 = vmul.f32 0.03125, %v162_v40 }
 0x19d   :  { %3008 = vrsqrt.f32 %v169_v39 }
 0x19e   :  { %v170_v43 = vadd.f32 1e-05, %v166_v42 }
 0x1a0   :  { %3010 = vrsqrt.f32 %v170_v43 }
 0x1a2   :  { %v3005_v46 = vpop.eup %3004 }
 0x1a3   :  { %v175_v47 = vmul.f32 %v3005_v46, %v143_v12 }
 0x1a5   :  { %v183_v53 = vmul.f32 %v182_v48, %v175_v47 }
 0x1a6   :  { %v3007_v50 = vpop.eup %3006 }
 0x1a7   :  { %v3009_v51 = vpop.eup %3008  ;;  %v176_v52 = vmul.f32 %v3007_v50, %v144_v20  ;;  %v191_v59 = vadd.f32 %v190_v54, %v183_v53 }
 0x1a8   :  { %v177_v55 = vmul.f32 %v3009_v51, %v145_v13 }
 0x1a9   :  { %v184_v56 = vmul.f32 %v182_v48, %v176_v52 }
 0x1aa   :  { %v3011_v57 = vpop.eup %3010  ;;  %v185_v61 = vmul.f32 %v182_v48, %v177_v55 }
 0x1ab   :  { %v178_v58 = vmul.f32 %v3011_v57, %v146_v21  ;;  %v192_v60 = vadd.f32 %v190_v54, %v184_v56 }
 0x1ac   :  { %v193_v0 = vadd.f32 %v190_v54, %v185_v61 }
 0x1ad   :  { %v195_v62 = vpack.c.bf16 %v192_v60, %v191_v59  ;;  %v186_v63 = vmul.f32 %v182_v48, %v178_v58 }
 0x1af   :  { %2735 = vmatprep.mubr.msk.bf16.mxu0 %vm125_vm0, %v195_v62  ;;  %v194_v1 = vadd.f32 %v190_v54, %v186_v63 }
 0x1b1   :  { %v196_v2 = vpack.c.bf16 %v194_v1, %v193_v0 }
 0x1b3   :  { %2736 = vmatmul.mubr.msk.bf16.vlgmr.msra.gmra.mrb[0].mxu0 %vm125_vm0, %v196_v2 }
 0x1b4   :  { %2747 = vmatprep.mubr.msk.bf16.mxu0 %vm3269_vm1, %v3268_v3 }
 0x286   :  { %v2737_v5 = vpop.f32.mrb[0].mxu0 }
 0x287   :  { %v260_v6 = vpop.f32.mrb[1].mxu0  ;;  %v269_v13 = vadd.f32 %v2737_v5, %v2586_v4 }
 0x288   :  { %v261_v7 = vadd.f32 %v2586_v4, %v260_v6  ;;  %v2738_v8 = vpop.f32.mrb[2].mxu0 }
 0x289   :  { %v263_v9 = vpop.f32.mrb[3].mxu0  ;;  %v3501_v14 = vpack.c.bf16 %v269_v13, %v269_v13  ;;  %v272_v15 = vadd.f32 %v2738_v8, %v2586_v4 }
 0x28a   :  { %v3478_v10 = vpack.c.bf16 %v261_v7, %v261_v7  ;;  %v264_v11 = vadd.f32 %v2586_v4, %v263_v9 }
 0x28b   :  { %v3516_v16 = vpack.c.bf16 %v272_v15, %v272_v15 }
 0x28c   :  { %390 = vrot.lane.b32.xlu1 %v3478_v10, %s3270_s1  ;;  %277 = vrot.lane.b32.xlu0 %v3478_v10, %s3271_s3  ;;  %v3490_v12 = vpack.c.bf16 %v264_v11, %v264_v11 }
 0x290   :  { %388 = vrot.lane.b32.xlu1 %v3478_v10, %s3272_s25  ;;  %504 = vrot.lane.b32.xlu0 %v3478_v10, %s3273_s29 }
 0x294   :  { %506 = vrot.lane.b32.xlu1 %v3478_v10, %s3274_s30  ;;  %620 = vrot.lane.b32.xlu0 %v3478_v10, %s3275_s14 }
 0x298   :  { %622 = vrot.lane.b32.xlu1 %v3478_v10, %s3276_s6  ;;  %849 = vrot.lane.b32.xlu0 %v3490_v12, %s3270_s1 }
 0x29c   :  { %738 = vrot.lane.b32.xlu1 %v3490_v12, %s3271_s3  ;;  %964 = vrot.lane.b32.xlu0 %v3490_v12, %s3274_s30 }
 0x2a0   :  { %847 = vrot.lane.b32.xlu1 %v3490_v12, %s3272_s25  ;;  %1079 = vrot.lane.b32.xlu0 %v3490_v12, %s3276_s6 }
 0x2a4   :  { %962 = vrot.lane.b32.xlu1 %v3490_v12, %s3273_s29  ;;  %1194 = vrot.lane.b32.xlu0 %v3501_v14, %s3271_s3 }
 0x2a8   :  { %1077 = vrot.lane.b32.xlu1 %v3490_v12, %s3275_s14  ;;  %1303 = vrot.lane.b32.xlu0 %v3501_v14, %s3272_s25 }
 0x2ac   :  { %1305 = vrot.lane.b32.xlu1 %v3501_v14, %s3270_s1  ;;  %1418 = vrot.lane.b32.xlu0 %v3501_v14, %s3273_s29 }
 0x2b0   :  { %1420 = vrot.lane.b32.xlu1 %v3501_v14, %s3274_s30  ;;  %1533 = vrot.lane.b32.xlu0 %v3501_v14, %s3275_s14 }
 0x2b4   :  { %1535 = vrot.lane.b32.xlu1 %v3501_v14, %s3276_s6  ;;  %1761 = vrot.lane.b32.xlu0 %v3516_v16, %s3270_s1 }
 0x2b8   :  { %1650 = vrot.lane.b32.xlu1 %v3516_v16, %s3271_s3  ;;  %1876 = vrot.lane.b32.xlu0 %v3516_v16, %s3274_s30 }
 0x2bc   :  { %1759 = vrot.lane.b32.xlu1 %v3516_v16, %s3272_s25  ;;  %1991 = vrot.lane.b32.xlu0 %v3516_v16, %s3276_s6 }
 0x2c0   :  { %1874 = vrot.lane.b32.xlu1 %v3516_v16, %s3273_s29 }
 0x2c4   :  { %1989 = vrot.lane.b32.xlu1 %v3516_v16, %s3275_s14 }
 0x2fe   :  { %v278_v17 = vpop.permute.xlu0 %277  ;;  %v391_v19 = vpop.permute.xlu1 %390 }
 0x2ff   :  { %v284_v18 = vsel %vm279_vm2, %v278_v17, 0  ;;  %v396_v21 = vsel %vm279_vm2, %v391_v19, 0 }
 0x300   :  { %2740 = vmatpush3.bf16.xpose.msra.mxu1 %v284_v18 }
 0x301   :  { %2751 = vmatprep.subr.bf16.mxu1 %v3268_v3 }
 0x302   :  { %v389_v20 = vpop.permute.xlu1 %388  ;;  %v505_v25 = vpop.permute.xlu0 %504 }
 0x306   :  { %v507_v22 = vpop.permute.xlu1 %506  ;;  %v621_v28 = vpop.permute.xlu0 %620 }
 0x307   :  { %2742 = vmatmul.mubr.msk.bf16.vlgmr.msra.gmra.mrb[0].mxu1 %vm279_vm2, %v3478_v10  ;;  %v512_v23 = vsel %vm279_vm2, %v507_v22, 0 }
 0x308   :  { %2752 = vmatpush3.bf16.xpose.msra.mxu1 %v396_v21  ;;  %2753 = vmatprep.mubr.msk.bf16.mxu1 %vm3269_vm1, %v3268_v3 }
 0x309   :  { %2763 = vmatprep.subr.bf16.mxu1 %v3268_v3 }
 0x30a   :  { %v623_v24 = vpop.permute.xlu1 %622  ;;  %v850_v30 = vpop.permute.xlu0 %849 }
 0x30b   :  { %v628_v26 = vsel %vm279_vm2, %v623_v24, 0  ;;  %v855_v31 = vsel %vm279_vm2, %v850_v30, 0 }
 0x30e   :  { %v739_v27 = vpop.permute.xlu1 %738  ;;  %v965_v32 = vpop.permute.xlu0 %964 }
 0x30f   :  { %2754 = vmatmul.mubr.msk.bf16.vlgmr.msra.gmra.mrb[4].mxu1 %vm279_vm2, %v389_v20  ;;  %v744_v29 = vsel %vm279_vm2, %v739_v27, 0  ;;  %v970_v34 = vsel %vm279_vm2, %v965_v32, 0 }
 0x310   :  { %2764 = vmatpush3.bf16.xpose.msra.mxu1 %v512_v23  ;;  %2765 = vmatprep.mubr.msk.bf16.mxu1 %vm3269_vm1, %v3268_v3 }
 0x311   :  { %2775 = vmatprep.subr.bf16.mxu1 %v3268_v3 }
 0x312   :  { %v848_v33 = vpop.permute.xlu1 %847  ;;  %v1080_v35 = vpop.permute.xlu0 %1079 }
 0x313   :  { %v1085_v37 = vsel %vm279_vm2, %v1080_v35, 0 }
 0x316   :  { %v963_v36 = vpop.permute.xlu1 %962  ;;  %v1195_v38 = vpop.permute.xlu0 %1194 }
 0x317   :  { %2766 = vmatmul.mubr.msk.bf16.vlgmr.msra.gmra.mrb[8].mxu1 %vm279_vm2, %v505_v25  ;;  %v1200_v40 = vsel %vm279_vm2, %v1195_v38, 0 }
 0x318   :  { %2776 = vmatpush3.bf16.xpose.msra.mxu1 %v628_v26  ;;  %2777 = vmatprep.mubr.msk.bf16.mxu1 %vm3269_vm1, %v3268_v3 }
 0x319   :  { %2787 = vmatprep.subr.bf16.mxu1 %v3268_v3 }
 0x31a   :  { %v1078_v39 = vpop.permute.xlu1 %1077  ;;  %v1304_v46 = vpop.permute.xlu0 %1303 }
 0x31e   :  { %v1306_v42 = vpop.permute.xlu1 %1305  ;;  %v1419_v50 = vpop.permute.xlu0 %1418 }
 0x31f   :  { %2778 = vmatmul.mubr.msk.bf16.vlgmr.msra.gmra.mrb[12].mxu1 %vm279_vm2, %v621_v28  ;;  %v1311_v43 = vsel %vm279_vm2, %v1306_v42, 0 }
 0x320   :  { %2788 = vmatpush3.bf16.xpose.msra.mxu1 %v744_v29  ;;  %2789 = vmatprep.mubr.msk.bf16.mxu1 %vm3269_vm1, %v3268_v3 }
 0x321   :  { %2799 = vmatprep.subr.bf16.mxu1 %v3268_v3 }
 0x322   :  { %v1421_v45 = vpop.permute.xlu1 %1420  ;;  %v1534_v53 = vpop.permute.xlu0 %1533 }
 0x323   :  { %v1426_v47 = vsel %vm279_vm2, %v1421_v45, 0 }
 0x326   :  { %v1536_v48 = vpop.permute.xlu1 %1535  ;;  %v1762_v55 = vpop.permute.xlu0 %1761 }
 0x327   :  { %2790 = vmatmul.mubr.msk.bf16.vlgmr.msra.gmra.mrb[16].mxu1 %vm279_vm2, %v3490_v12  ;;  %v1541_v51 = vsel %vm279_vm2, %v1536_v48, 0  ;;  %v1767_v56 = vsel %vm279_vm2, %v1762_v55, 0 }
 0x328   :  { %2800 = vmatpush3.bf16.xpose.msra.mxu1 %v855_v31  ;;  %2801 = vmatprep.mubr.msk.bf16.mxu1 %vm3269_vm1, %v3268_v3 }
 0x329   :  { %2811 = vmatprep.subr.bf16.mxu1 %v3268_v3 }
 0x32a   :  { %v1651_v52 = vpop.permute.xlu1 %1650  ;;  %v1877_v57 = vpop.permute.xlu0 %1876 }
 0x32b   :  { %v1656_v54 = vsel %vm279_vm2, %v1651_v52, 0  ;;  %v1882_v59 = vsel %vm279_vm2, %v1877_v57, 0 }
 0x32e   :  { %v1760_v58 = vpop.permute.xlu1 %1759  ;;  %v1992_v60 = vpop.permute.xlu0 %1991 }
 0x32f   :  { %2802 = vmatmul.mubr.msk.bf16.vlgmr.msra.gmra.mrb[20].mxu1 %vm279_vm2, %v848_v33  ;;  %v1997_v62 = vsel %vm279_vm2, %v1992_v60, 0 }
 0x330   :  { %2812 = vmatpush3.bf16.xpose.msra.mxu1 %v970_v34  ;;  %2813 = vmatprep.mubr.msk.bf16.mxu1 %vm3269_vm1, %v3268_v3 }
 0x331   :  { %2823 = vmatprep.subr.bf16.mxu1 %v3268_v3 }
 0x332   :  { %v1875_v61 = vpop.permute.xlu1 %1874 }
 0x336   :  { %v1990_v63 = vpop.permute.xlu1 %1989 }
 0x337   :  { %2814 = vmatmul.mubr.msk.bf16.vlgmr.msra.gmra.mrb[24].mxu1 %vm279_vm2, %v963_v36 }
 0x338   :  { %2824 = vmatpush3.bf16.xpose.msra.mxu1 %v1085_v37  ;;  %2825 = vmatprep.mubr.msk.bf16.mxu1 %vm3269_vm1, %v3268_v3 }
 0x339   :  { %2835 = vmatprep.subr.bf16.mxu1 %v3268_v3 }
 0x33f   :  { %2826 = vmatmul.mubr.msk.bf16.vlgmr.msra.gmra.mrb[28].mxu1 %vm279_vm2, %v1078_v39 }
 0x340   :  { %2836 = vmatpush3.bf16.xpose.msra.mxu1 %v1200_v40  ;;  %2837 = vmatprep.mubr.msk.bf16.mxu1 %vm3269_vm1, %v3268_v3 }
 0x341   :  { %2847 = vmatprep.subr.bf16.mxu1 %v3268_v3 }
 0x347   :  { %2838 = vmatmul.mubr.msk.bf16.vlgmr.msra.gmra.mrb[32].mxu1 %vm279_vm2, %v3501_v14 }
 0x348   :  { %2848 = vmatpush3.bf16.xpose.msra.mxu1 %v1311_v43  ;;  %2849 = vmatprep.mubr.msk.bf16.mxu1 %vm3269_vm1, %v3268_v3 }
 0x349   :  { %2859 = vmatprep.subr.bf16.mxu1 %v3268_v3 }
 0x34f   :  { %2850 = vmatmul.mubr.msk.bf16.vlgmr.msra.gmra.mrb[36].mxu1 %vm279_vm2, %v1304_v46 }
 0x350   :  { %2860 = vmatpush3.bf16.xpose.msra.mxu1 %v1426_v47  ;;  %2861 = vmatprep.mubr.msk.bf16.mxu1 %vm3269_vm1, %v3268_v3 }
 0x351   :  { %2871 = vmatprep.subr.bf16.mxu1 %v3268_v3 }
 0x357   :  { %2862 = vmatmul.mubr.msk.bf16.vlgmr.msra.gmra.mrb[40].mxu1 %vm279_vm2, %v1419_v50 }
 0x358   :  { %2872 = vmatpush3.bf16.xpose.msra.mxu1 %v1541_v51  ;;  %2873 = vmatprep.mubr.msk.bf16.mxu1 %vm3269_vm1, %v3268_v3 }
 0x359   :  { %2883 = vmatprep.subr.bf16.mxu1 %v3268_v3 }
 0x35f   :  { %2874 = vmatmul.mubr.msk.bf16.vlgmr.msra.gmra.mrb[44].mxu1 %vm279_vm2, %v1534_v53 }
 0x360   :  { %2884 = vmatpush3.bf16.xpose.msra.mxu1 %v1656_v54  ;;  %2885 = vmatprep.mubr.msk.bf16.mxu1 %vm3269_vm1, %v3268_v3 }
 0x361   :  { %2895 = vmatprep.subr.bf16.mxu1 %v3268_v3 }
 0x367   :  { %2886 = vmatmul.mubr.msk.bf16.vlgmr.msra.gmra.mrb[48].mxu1 %vm279_vm2, %v3516_v16 }
 0x368   :  { %2896 = vmatpush3.bf16.xpose.msra.mxu1 %v1767_v56  ;;  %2897 = vmatprep.mubr.msk.bf16.mxu1 %vm3269_vm1, %v3268_v3 }
 0x369   :  { %2907 = vmatprep.subr.bf16.mxu1 %v3268_v3 }
 0x36f   :  { %2898 = vmatmul.mubr.msk.bf16.vlgmr.msra.gmra.mrb[52].mxu1 %vm279_vm2, %v1760_v58 }
 0x370   :  { %2908 = vmatpush3.bf16.xpose.msra.mxu1 %v1882_v59  ;;  %2909 = vmatprep.mubr.msk.bf16.mxu1 %vm3269_vm1, %v3268_v3 }
 0x371   :  { %2919 = vmatprep.subr.bf16.mxu1 %v3268_v3 }
 0x377   :  { %2910 = vmatmul.mubr.msk.bf16.vlgmr.msra.gmra.mrb[56].mxu1 %vm279_vm2, %v1875_v61 }
 0x378   :  { %2920 = vmatpush3.bf16.xpose.msra.mxu1 %v1997_v62  ;;  %2921 = vmatprep.mubr.msk.bf16.mxu1 %vm3269_vm1, %v3268_v3 }
 0x37f   :  { %2922 = vmatmul.mubr.msk.bf16.vlgmr.msra.gmra.mrb[60].mxu1 %vm279_vm2, %v1990_v63 }
 0x3da   :  { %v3611_v0 = vpop.f32.mrb[0].mxu1 }
 0x3db   :  { %v2743_v1 = vpop.f32.mrb[1].mxu1  ;;  %v326_v2 = vsel %vm279_vm2, %v3611_v0, -inf }
 0x3dc   :  { %327 = vmax.xlane.f32.xlu0 %v326_v2  ;;  %v323_v4 = vpop.f32.mrb[2].mxu1 }
 0x3dd   :  { %v2744_v5 = vpop.f32.mrb[3].mxu1 }
 0x3e2   :  { %v3615_v6 = vpop.f32.mrb[4].mxu1 }
 0x3e3   :  { %v2755_v7 = vpop.f32.mrb[5].mxu1  ;;  %v438_v8 = vsel %vm279_vm2, %v3615_v6, -inf }
 0x3e4   :  { %439 = vmax.xlane.f32.xlu1 %v438_v8  ;;  %v435_v9 = vpop.f32.mrb[6].mxu1 }
 0x3e5   :  { %v2756_v11 = vpop.f32.mrb[7].mxu1 }
 0x3ea   :  { %v3619_v13 = vpop.f32.mrb[8].mxu1 }
 0x3eb   :  { %v2767_v15 = vpop.f32.mrb[9].mxu1  ;;  %v554_v17 = vsel %vm279_vm2, %v3619_v13, -inf }
 0x3ec   :  { %555 = vmax.xlane.f32.xlu0 %v554_v17  ;;  %v551_v18 = vpop.f32.mrb[10].mxu1 }
 0x3ed   :  { %v2768_v19 = vpop.f32.mrb[11].mxu1 }
 0x3f2   :  { %v3623_v20 = vpop.f32.mrb[12].mxu1 }
 0x3f3   :  { %v2779_v21 = vpop.f32.mrb[13].mxu1  ;;  %v670_v22 = vsel %vm279_vm2, %v3623_v20, -inf }
 0x3f4   :  { %671 = vmax.xlane.f32.xlu0 %v670_v22  ;;  %v667_v23 = vpop.f32.mrb[14].mxu1 }
 0x3f5   :  { %v2780_v24 = vpop.f32.mrb[15].mxu1 }
 0x3fa   :  { %v3627_v25 = vpop.f32.mrb[16].mxu1 }
 0x3fb   :  { %v2791_v26 = vpop.f32.mrb[17].mxu1  ;;  %v786_v27 = vsel %vm279_vm2, %v3627_v25, -inf }
 0x3fc   :  { %787 = vmax.xlane.f32.xlu0 %v786_v27  ;;  %v783_v28 = vpop.f32.mrb[18].mxu1 }
 0x3fd   :  { %v2792_v29 = vpop.f32.mrb[19].mxu1 }
 0x402   :  { %v3631_v30 = vpop.f32.mrb[20].mxu1 }
 0x403   :  { %v2803_v31 = vpop.f32.mrb[21].mxu1  ;;  %v897_v32 = vsel %vm279_vm2, %v3631_v30, -inf }
 0x404   :  { %898 = vmax.xlane.f32.xlu1 %v897_v32  ;;  %v894_v33 = vpop.f32.mrb[22].mxu1 }
 0x405   :  { %v2804_v34 = vpop.f32.mrb[23].mxu1 }
 0x40a   :  { %v3635_v35 = vpop.f32.mrb[24].mxu1 }
 0x40b   :  { %v2815_v36 = vpop.f32.mrb[25].mxu1  ;;  %v1012_v37 = vsel %vm279_vm2, %v3635_v35, -inf }
 0x40c   :  { %1013 = vmax.xlane.f32.xlu0 %v1012_v37  ;;  %v1009_v38 = vpop.f32.mrb[26].mxu1 }
 0x40d   :  { %v2816_v39 = vpop.f32.mrb[27].mxu1 }
 0x412   :  { %v3639_v40 = vpop.f32.mrb[28].mxu1 }
 0x413   :  { %v2827_v42 = vpop.f32.mrb[29].mxu1  ;;  %v1127_v43 = vsel %vm279_vm2, %v3639_v40, -inf }
 0x414   :  { %1128 = vmax.xlane.f32.xlu1 %v1127_v43  ;;  %v1124_v45 = vpop.f32.mrb[30].mxu1 }
 0x415   :  { %v2828_v46 = vpop.f32.mrb[31].mxu1 }
 0x41a   :  { %v3643_v47 = vpop.f32.mrb[32].mxu1 }
 0x41b   :  { %v2839_v48 = vpop.f32.mrb[33].mxu1  ;;  %v1242_v50 = vsel %vm279_vm2, %v3643_v47, -inf }
 0x41c   :  { %1243 = vmax.xlane.f32.xlu0 %v1242_v50  ;;  %v1239_v51 = vpop.f32.mrb[34].mxu1 }
 0x41d   :  { %v2840_v52 = vpop.f32.mrb[35].mxu1 }
 0x422   :  { %v3647_v53 = vpop.f32.mrb[36].mxu1 }
 0x423   :  { %v2851_v54 = vpop.f32.mrb[37].mxu1  ;;  %v1353_v55 = vsel %vm279_vm2, %v3647_v53, -inf }
 0x424   :  { %1354 = vmax.xlane.f32.xlu1 %v1353_v55  ;;  %v1350_v56 = vpop.f32.mrb[38].mxu1 }
 0x425   :  { %v2852_v57 = vpop.f32.mrb[39].mxu1 }
 0x42a   :  { %v3651_v58 = vpop.f32.mrb[40].mxu1 }
 0x42b   :  { %v2863_v59 = vpop.f32.mrb[41].mxu1  ;;  %v1468_v23 = vsel %vm279_vm2, %v3651_v58, -inf }
 0x42c   :  { %v1465_v60 = vpop.f32.mrb[42].mxu1 }
 0x42d   :  { %v2864_v61 = vpop.f32.mrb[43].mxu1 }
 0x432   :  { %450 = vrot.lane.b32.xlu0 %v3478_v10, %s3277_s7  ;;  %v3655_v62 = vpop.f32.mrb[44].mxu1 }
 0x433   :  { %v2875_v63 = vpop.f32.mrb[45].mxu1  ;;  %v1583_v28 = vsel %vm279_vm2, %v3655_v62, -inf }
 0x434   :  { %v1580_v1 = vpop.f32.mrb[46].mxu1 }
 0x435   :  { %338 = vrot.lane.b32.xlu1 %v3478_v10, %s3261_s18  ;;  %v2876_v2 = vpop.f32.mrb[47].mxu1 }
 0x43a   :  { %v3659_v4 = vpop.f32.mrb[48].mxu1 }
 0x43b   :  { %v2887_v5 = vpop.f32.mrb[49].mxu1  ;;  %v1698_v31 = vsel %vm279_vm2, %v3659_v4, -inf }
 0x43c   :  { %v1695_v7 = vpop.f32.mrb[50].mxu1 }
 0x43d   :  { %v2888_v8 = vpop.f32.mrb[51].mxu1 }
 0x442   :  { %v3661_v9 = vpop.f32.mrb[52].mxu1 }
 0x443   :  { %v2899_v11 = vpop.f32.mrb[53].mxu1  ;;  %v1809_v32 = vsel %vm279_vm2, %v3661_v9, -inf }
 0x444   :  { %v1806_v15 = vpop.f32.mrb[54].mxu1 }
 0x445   :  { %v2900_v17 = vpop.f32.mrb[55].mxu1 }
 0x44a   :  { %v3663_v18 = vpop.f32.mrb[56].mxu1 }
 0x44b   :  { %v2911_v19 = vpop.f32.mrb[57].mxu1  ;;  %v1924_v33 = vsel %vm279_vm2, %v3663_v18, -inf }
 0x44c   :  { %v1921_v21 = vpop.f32.mrb[58].mxu1 }
 0x44d   :  { %v2912_v22 = vpop.f32.mrb[59].mxu1 }
 0x451   :  { %1469 = vmax.xlane.f32.xlu0 %v1468_v23 }
 0x452   :  { %v3667_v24 = vpop.f32.mrb[60].mxu1 }
 0x453   :  { %v2923_v26 = vpop.f32.mrb[61].mxu1  ;;  %v2039_v34 = vsel %vm279_vm2, %v3667_v24, -inf }
 0x454   :  { %v2036_v27 = vpop.f32.mrb[62].mxu1 }
 0x455   :  { %1584 = vmax.xlane.f32.xlu0 %v1583_v28  ;;  %v2924_v29 = vpop.f32.mrb[63].mxu1 }
 0x459   :  { %1699 = vmax.xlane.f32.xlu0 %v1698_v31 }
 0x45d   :  { %1810 = vmax.xlane.f32.xlu0 %v1809_v32 }
 0x461   :  { %1925 = vmax.xlane.f32.xlu0 %v1924_v33 }
 0x465   :  { %2040 = vmax.xlane.f32.xlu0 %v2039_v34 }
 0x469   :  { %v328_v36 = vpop.xlane.xlu0 %327 }
 0x46a   :  { %v329_v37 = vsub.f32 %v3611_v0, %v328_v36 }
 0x46c   :  { %v330_v38 = vmul.f32 1.442695, %v329_v37 }
 0x46e   :  { %3012 = vpow2.f32 %v330_v38 }
 0x471   :  { %v440_v39 = vpop.xlane.xlu1 %439 }
 0x472   :  { %v441_v42 = vsub.f32 %v3615_v6, %v440_v39 }
 0x474   :  { %v442_v43 = vmul.f32 1.442695, %v441_v42 }
 0x476   :  { %3014 = vpow2.f32 %v442_v43 }
 0x478   :  { %v3681_v45 = vpop.eup %3012 }
 0x479   :  { %v556_v46 = vpop.xlane.xlu0 %555  ;;  %v332_v48 = vsel %vm279_vm2, %v3681_v45, 0.0 }
 0x47a   :  { %v557_v50 = vsub.f32 %v3619_v13, %v556_v46  ;;  %333 = vadd.xlane.f32.xlu1 %v332_v48 }
 0x47c   :  { %v558_v51 = vmul.f32 1.442695, %v557_v50 }
 0x47e   :  { %3016 = vpow2.f32 %v558_v51 }
 0x480   :  { %v3686_v52 = vpop.eup %3014 }
 0x481   :  { %v672_v0 = vpop.xlane.xlu0 %671  ;;  %v444_v54 = vsel %vm279_vm2, %v3686_v52, 0.0 }
 0x482   :  { %v673_v6 = vsub.f32 %v3623_v20, %v672_v0  ;;  %445 = vadd.xlane.f32.xlu1 %v444_v54 }
 0x484   :  { %v674_v55 = vmul.f32 1.442695, %v673_v6 }
 0x486   :  { %3018 = vpow2.f32 %v674_v55 }
 0x488   :  { %v3691_v56 = vpop.eup %3016 }
 0x489   :  { %v788_v57 = vpop.xlane.xlu0 %787  ;;  %v560_v13 = vsel %vm279_vm2, %v3691_v56, 0.0 }
 0x48a   :  { %v789_v59 = vsub.f32 %v3627_v25, %v788_v57  ;;  %561 = vadd.xlane.f32.xlu1 %v560_v13 }
 0x48c   :  { %v790_v60 = vmul.f32 1.442695, %v789_v59 }
 0x48e   :  { %3020 = vpow2.f32 %v790_v60 }
 0x490   :  { %v3696_v61 = vpop.eup %3018 }
 0x491   :  { %v899_v63 = vpop.xlane.xlu1 %898  ;;  %v676_v20 = vsel %vm279_vm2, %v3696_v61, 0.0 }
 0x492   :  { %v900_v1 = vsub.f32 %v3631_v30, %v899_v63  ;;  %677 = vadd.xlane.f32.xlu1 %v676_v20 }
 0x494   :  { %v901_v2 = vmul.f32 1.442695, %v900_v1 }
 0x496   :  { %3022 = vpow2.f32 %v901_v2 }
 0x498   :  { %v3701_v5 = vpop.eup %3020 }
 0x499   :  { %v792_v7 = vsel %vm279_vm2, %v3701_v5, 0.0  ;;  %v1014_v17 = vpop.xlane.xlu0 %1013 }
 0x49a   :  { %793 = vadd.xlane.f32.xlu0 %v792_v7  ;;  %v1015_v21 = vsub.f32 %v3635_v35, %v1014_v17 }
 0x49c   :  { %v1016_v22 = vmul.f32 1.442695, %v1015_v21 }
 0x49e   :  { %3024 = vpow2.f32 %v1016_v22 }
 0x4a0   :  { %v3705_v25 = vpop.eup %3022 }
 0x4a1   :  { %v903_v8 = vsel %vm279_vm2, %v3705_v25, 0.0  ;;  %v1129_v11 = vpop.xlane.xlu1 %1128 }
 0x4a2   :  { %904 = vadd.xlane.f32.xlu1 %v903_v8  ;;  %v1130_v23 = vsub.f32 %v3639_v40, %v1129_v11 }
 0x4a4   :  { %v1131_v26 = vmul.f32 1.442695, %v1130_v23 }
 0x4a6   :  { %3026 = vpow2.f32 %v1131_v26 }
 0x4a8   :  { %v3729_v29 = vpop.eup %3024 }
 0x4b0   :  { %566 = vrot.lane.b32.xlu0 %v3478_v10, %s3278_s19  ;;  %v3735_v31 = vpop.eup %3026 }
 0x4b1   :  { %v1355_v30 = vpop.xlane.xlu1 %1354 }
 0x4b2   :  { %v1356_v35 = vsub.f32 %v3647_v53, %v1355_v30 }
 0x4b3   :  { %682 = vrot.lane.b32.xlu1 %v3478_v10, %s3279_s26  ;;  %v1244_v10 = vpop.xlane.xlu0 %1243 }
 0x4b4   :  { %v1245_v27 = vsub.f32 %v3643_v47, %v1244_v10  ;;  %v1357_v40 = vmul.f32 1.442695, %v1356_v35  ;;  %v1018_v47 = vsel %vm279_vm2, %v3729_v29, 0.0 }
 0x4b5   :  { %v339_v15 = vpop.permute.xlu1 %338 }
 0x4b6   :  { %v345_v19 = vsel %vm343_vm3, %v339_v15, 0  ;;  %v1246_v28 = vmul.f32 1.442695, %v1245_v27 }
 0x4b7   :  { %2746 = vmatpush3.bf16.msra.mxu0 %v345_v19  ;;  %798 = vrot.lane.b32.xlu1 %v3490_v12, %s3261_s18  ;;  %v451_v34 = vpop.permute.xlu0 %450 }
 0x4b8   :  { %2757 = vmatprep.subr.bf16.mxu0 %v3268_v3  ;;  %3028 = vpow2.f32 %v1246_v28  ;;  %v456_v21 = vsel %vm343_vm3, %v451_v34, 0 }
 0x4b9   :  { %3030 = vpow2.f32 %v1357_v40 }
 0x4bb   :  { %909 = vrot.lane.b32.xlu1 %v3490_v12, %s3277_s7 }
 0x4bf   :  { %1024 = vrot.lane.b32.xlu1 %v3490_v12, %s3278_s19 }
 0x4c2   :  { %v3741_v53 = vpop.eup %3028 }
 0x4c3   :  { %1139 = vrot.lane.b32.xlu1 %v3490_v12, %s3279_s26  ;;  %v1133_v12 = vsel %vm279_vm2, %v3735_v31, 0.0  ;;  %v1248_v32 = vsel %vm279_vm2, %v3741_v53, 0.0  ;;  %v3747_v33 = vpop.eup %3030 }
 0x4c4   :  { %v1359_v36 = vsel %vm279_vm2, %v3747_v33, 0.0 }
 0x4c7   :  { %1254 = vrot.lane.b32.xlu1 %v3501_v14, %s3261_s18 }
 0x4cb   :  { %1365 = vrot.lane.b32.xlu1 %v3501_v14, %s3277_s7 }
 0x4cf   :  { %1480 = vrot.lane.b32.xlu1 %v3501_v14, %s3278_s19  ;;  %1019 = vadd.xlane.f32.xlu0 %v1018_v47 }
 0x4d3   :  { %1595 = vrot.lane.b32.xlu1 %v3501_v14, %s3279_s26  ;;  %1134 = vadd.xlane.f32.xlu0 %v1133_v12 }
 0x4d7   :  { %1710 = vrot.lane.b32.xlu1 %v3516_v16, %s3261_s18  ;;  %1249 = vadd.xlane.f32.xlu0 %v1248_v32  ;;  %s3280_s18 = smov 8  }
 0x4db   :  { %1936 = vrot.lane.b32.xlu1 %v3516_v16, %s3278_s19  ;;  %1360 = vadd.xlane.f32.xlu0 %v1359_v36  ;;  %s3283_s19 = smov [#allocation14]  }
 0x4de   :  { %v1470_v37 = vpop.xlane.xlu0 %1469 }
 0x4df   :  { %v1471_v14 = vsub.f32 %v3651_v58, %v1470_v37  ;;  %2051 = vrot.lane.b32.xlu1 %v3516_v16, %s3279_s26  ;;  %s2571_s26 = sshll.u32 %s3283_s19, 4  ;;  %s2572_s26 = int_to_ptr.vmem [resolvable:$true] %s2571_s26 }
 0x4e0   :  { %p3233_p7 = scmp.lt.s32.totalorder %s2572_s26, %s2572_s26 }
 0x4e1   :  { %v1472_v38 = vmul.f32 1.442695, %v1471_v14 }
 0x4e2   :  { %v1585_v39 = vpop.xlane.xlu0 %1584 }
 0x4e3   :  { %3032 = vpow2.f32 %v1472_v38  ;;  %v1586_v42 = vsub.f32 %v3655_v62, %v1585_v39 }
 0x4e5   :  { %v1587_v43 = vmul.f32 1.442695, %v1586_v42 }
 0x4e6   :  { %v1700_v46 = vpop.xlane.xlu0 %1699 }
 0x4e7   :  { %3034 = vpow2.f32 %v1587_v43  ;;  %v1701_v48 = vsub.f32 %v3659_v4, %v1700_v46 }
 0x4e9   :  { %v1702_v50 = vmul.f32 1.442695, %v1701_v48 }
 0x4ea   :  { %v1811_v51 = vpop.xlane.xlu0 %1810 }
 0x4eb   :  { %3036 = vpow2.f32 %v1702_v50  ;;  %v1812_v0 = vsub.f32 %v3661_v9, %v1811_v51 }
 0x4ed   :  { %v3761_v54 = vpop.eup %3032  ;;  %v1813_v58 = vmul.f32 1.442695, %v1812_v0 }
 0x4ee   :  { %v1926_v6 = vpop.xlane.xlu0 %1925  ;;  %v1474_v55 = vsel %vm279_vm2, %v3761_v54, 0.0 }
 0x4ef   :  { %3038 = vpow2.f32 %v1813_v58  ;;  %v1927_v62 = vsub.f32 %v3663_v18, %v1926_v6  ;;  %1475 = vadd.xlane.f32.xlu0 %v1474_v55 }
 0x4f1   :  { %v3766_v57 = vpop.eup %3034  ;;  %v1928_v13 = vmul.f32 1.442695, %v1927_v62 }
 0x4f2   :  { %v2041_v4 = vpop.xlane.xlu0 %2040  ;;  %v1589_v59 = vsel %vm279_vm2, %v3766_v57, 0.0 }
 0x4f3   :  { %3040 = vpow2.f32 %v1928_v13  ;;  %v2042_v9 = vsub.f32 %v3667_v24, %v2041_v4  ;;  %1590 = vadd.xlane.f32.xlu0 %v1589_v59 }
 0x4f5   :  { %v3771_v60 = vpop.eup %3036  ;;  %v2043_v63 = vmul.f32 1.442695, %v2042_v9 }
 0x4f6   :  { %v1704_v20 = vsel %vm279_vm2, %v3771_v60, 0.0 }
 0x4f7   :  { %3042 = vpow2.f32 %v2043_v63  ;;  %1705 = vadd.xlane.f32.xlu0 %v1704_v20 }
 0x4f9   :  { %v3775_v18 = vpop.eup %3038 }
 0x4fa   :  { %v1815_v1 = vsel %vm279_vm2, %v3775_v18, 0.0 }
 0x4fb   :  { %1816 = vadd.xlane.f32.xlu0 %v1815_v1 }
 0x4fd   :  { %v3779_v2 = vpop.eup %3040 }
 0x4fe   :  { %v1930_v24 = vsel %vm279_vm2, %v3779_v2, 0.0 }
 0x4ff   :  { %1931 = vadd.xlane.f32.xlu0 %v1930_v24 }
 0x501   :  { %v3783_v7 = vpop.eup %3042 }
 0x502   :  { %v2045_v8 = vsel %vm279_vm2, %v3783_v7, 0.0 }
 0x503   :  { %2046 = vadd.xlane.f32.xlu0 %v2045_v8 }
 0x507   :  { %v334_v11 = vpop.xlane.xlu1 %333 }
 0x508   :  { %3044 = vrcp.f32 %v334_v11 }
 0x50f   :  { %v446_v30 = vpop.xlane.xlu1 %445 }
 0x510   :  { %3046 = vrcp.f32 %v446_v30 }
 0x512   :  { %v3045_v15 = vpop.eup %3044 }
 0x513   :  { %v336_v17 = vmul.f32 %v3045_v15, %v3681_v45 }
 0x515   :  { %v337_v19 = vpack.c.bf16 %v336_v17, %v336_v17 }
 0x517   :  { %2748 = vmatmul.mubr.msk.bf16.vlgmr.msra.gmra.mrb[4].mxu0 %vm279_vm2, %v337_v19  ;;  %v562_v23 = vpop.xlane.xlu1 %561 }
 0x518   :  { %2758 = vmatpush3.bf16.msra.mxu0 %v456_v21  ;;  %2759 = vmatprep.mubr.msk.bf16.mxu0 %vm3269_vm1, %v3268_v3  ;;  %3048 = vrcp.f32 %v562_v23 }
 0x519   :  { %1821 = vrot.lane.b32.xlu0 %v3516_v16, %s3277_s7  ;;  %2769 = vmatprep.subr.bf16.mxu0 %v3268_v3 }
 0x51a   :  { %v3047_v22 = vpop.eup %3046 }
 0x51b   :  { %v448_v10 = vmul.f32 %v3047_v22, %v3686_v52 }
 0x51d   :  { %v449_v45 = vpack.c.bf16 %v448_v10, %v448_v10 }
 0x51f   :  { %2760 = vmatmul.mubr.msk.bf16.vlgmr.msra.gmra.mrb[8].mxu0 %vm279_vm2, %v449_v45  ;;  %v678_v26 = vpop.xlane.xlu1 %677 }
 0x520   :  { %2771 = vmatprep.mubr.msk.bf16.mxu0 %vm3269_vm1, %v3268_v3  ;;  %3050 = vrcp.f32 %v678_v26 }
 0x522   :  { %v3049_v27 = vpop.eup %3048 }
 0x523   :  { %v564_v35 = vmul.f32 %v3049_v27, %v3691_v56 }
 0x525   :  { %v565_v47 = vpack.c.bf16 %v564_v35, %v564_v35 }
 0x527   :  { %v794_v28 = vpop.xlane.xlu0 %793 }
 0x528   :  { %3052 = vrcp.f32 %v794_v28 }
 0x52a   :  { %v3051_v52 = vpop.eup %3050 }
 0x52b   :  { %v567_v16 = vpop.permute.xlu0 %566  ;;  %v680_v32 = vmul.f32 %v3051_v52, %v3696_v61 }
 0x52c   :  { %v572_v40 = vsel %vm343_vm3, %v567_v16, 0 }
 0x52d   :  { %2770 = vmatpush3.bf16.msra.mxu0 %v572_v40  ;;  %v681_v36 = vpack.c.bf16 %v680_v32, %v680_v32 }
 0x52e   :  { %2781 = vmatprep.subr.bf16.mxu0 %v3268_v3 }
 0x52f   :  { %v905_v12 = vpop.xlane.xlu1 %904 }
 0x530   :  { %2772 = vmatmul.mubr.msk.bf16.vlgmr.msra.gmra.mrb[12].mxu0 %vm279_vm2, %v565_v47  ;;  %3054 = vrcp.f32 %v905_v12 }
 0x531   :  { %2783 = vmatprep.mubr.msk.bf16.mxu0 %vm3269_vm1, %v3268_v3 }
 0x532   :  { %v3053_v37 = vpop.eup %3052 }
 0x533   :  { %v683_v34 = vpop.permute.xlu1 %682  ;;  %v796_v61 = vmul.f32 %v3053_v37, %v3701_v5 }
 0x534   :  { %v688_v56 = vsel %vm343_vm3, %v683_v34, 0 }
 0x535   :  { %2782 = vmatpush3.bf16.msra.mxu0 %v688_v56  ;;  %v797_v42 = vpack.c.bf16 %v796_v61, %v796_v61 }
 0x536   :  { %2793 = vmatprep.subr.bf16.mxu0 %v3268_v3 }
 0x537   :  { %v799_v14 = vpop.permute.xlu1 %798 }
 0x538   :  { %v804_v38 = vsel %vm343_vm3, %v799_v14, 0  ;;  %2784 = vmatmul.mubr.msk.bf16.vlgmr.msra.gmra.mrb[16].mxu0 %vm279_vm2, %v681_v36 }
 0x539   :  { %2794 = vmatpush3.bf16.msra.mxu0 %v804_v38  ;;  %2795 = vmatprep.mubr.msk.bf16.mxu0 %vm3269_vm1, %v3268_v3 }
 0x53a   :  { %2805 = vmatprep.subr.bf16.mxu0 %v3268_v3  ;;  %v3055_v43 = vpop.eup %3054 }
 0x53b   :  { %v910_v39 = vpop.permute.xlu1 %909  ;;  %v907_v48 = vmul.f32 %v3055_v43, %v3705_v25 }
 0x53c   :  { %v915_v46 = vsel %vm343_vm3, %v910_v39, 0 }
 0x53d   :  { %v908_v51 = vpack.c.bf16 %v907_v48, %v907_v48 }
 0x53f   :  { %v1025_v50 = vpop.permute.xlu1 %1024 }
 0x540   :  { %2796 = vmatmul.mubr.msk.bf16.vlgmr.msra.gmra.mrb[20].mxu0 %vm279_vm2, %v797_v42  ;;  %v1030_v5 = vsel %vm343_vm3, %v1025_v50, 0 }
 0x541   :  { %2806 = vmatpush3.bf16.msra.mxu0 %v915_v46  ;;  %2807 = vmatprep.mubr.msk.bf16.mxu0 %vm3269_vm1, %v3268_v3 }
 0x542   :  { %2817 = vmatprep.subr.bf16.mxu0 %v3268_v3 }
 0x543   :  { %v1140_v62 = vpop.permute.xlu1 %1139 }
 0x544   :  { %v1145_v59 = vsel %vm343_vm3, %v1140_v62, 0 }
 0x547   :  { %v1255_v20 = vpop.permute.xlu1 %1254 }
 0x548   :  { %2808 = vmatmul.mubr.msk.bf16.vlgmr.msra.gmra.mrb[24].mxu0 %vm279_vm2, %v908_v51  ;;  %v1260_v24 = vsel %vm343_vm3, %v1255_v20, 0 }
 0x549   :  { %2818 = vmatpush3.bf16.msra.mxu0 %v1030_v5  ;;  %2819 = vmatprep.mubr.msk.bf16.mxu0 %vm3269_vm1, %v3268_v3 }
 0x54a   :  { %2829 = vmatprep.subr.bf16.mxu0 %v3268_v3 }
 0x55c   :  { %v1020_v0 = vpop.xlane.xlu0 %1019 }
 0x55d   :  { %3056 = vrcp.f32 %v1020_v0 }
 0x560   :  { %v1135_v58 = vpop.xlane.xlu0 %1134 }
 0x561   :  { %3058 = vrcp.f32 %v1135_v58 }
 0x564   :  { %v1250_v6 = vpop.xlane.xlu0 %1249 }
 0x565   :  { %3060 = vrcp.f32 %v1250_v6 }
 0x567   :  { %v3057_v25 = vpop.eup %3056 }
 0x568   :  { %v1022_v55 = vmul.f32 %v3057_v25, %v3729_v29  ;;  %v1361_v63 = vpop.xlane.xlu0 %1360 }
 0x569   :  { %3062 = vrcp.f32 %v1361_v63 }
 0x56a   :  { %v1023_v13 = vpack.c.bf16 %v1022_v55, %v1022_v55 }
 0x56b   :  { %v3059_v4 = vpop.eup %3058 }
 0x56c   :  { %2820 = vmatmul.mubr.msk.bf16.vlgmr.msra.gmra.mrb[28].mxu0 %vm279_vm2, %v1023_v13  ;;  %v1137_v9 = vmul.f32 %v3059_v4, %v3735_v31  ;;  %v1366_v31 = vpop.permute.xlu1 %1365 }
 0x56d   :  { %2830 = vmatpush3.bf16.msra.mxu0 %v1145_v59  ;;  %2831 = vmatprep.mubr.msk.bf16.mxu0 %vm3269_vm1, %v3268_v3  ;;  %v1371_v15 = vsel %vm343_vm3, %v1366_v31, 0 }
 0x56e   :  { %2841 = vmatprep.subr.bf16.mxu0 %v3268_v3  ;;  %v1138_v29 = vpack.c.bf16 %v1137_v9, %v1137_v9 }
 0x56f   :  { %v3061_v1 = vpop.eup %3060 }
 0x570   :  { %v1252_v8 = vmul.f32 %v3061_v1, %v3741_v53  ;;  %v1481_v21 = vpop.permute.xlu1 %1480 }
 0x571   :  { %v1486_v23 = vsel %vm343_vm3, %v1481_v21, 0 }
 0x572   :  { %v1253_v11 = vpack.c.bf16 %v1252_v8, %v1252_v8 }
 0x573   :  { %v3063_v30 = vpop.eup %3062 }
 0x574   :  { %2832 = vmatmul.mubr.msk.bf16.vlgmr.msra.gmra.mrb[32].mxu0 %vm279_vm2, %v1138_v29  ;;  %v1363_v19 = vmul.f32 %v3063_v30, %v3747_v33  ;;  %v1596_v27 = vpop.permute.xlu1 %1595 }
 0x575   :  { %2842 = vmatpush3.bf16.msra.mxu0 %v1260_v24  ;;  %2843 = vmatprep.mubr.msk.bf16.mxu0 %vm3269_vm1, %v3268_v3  ;;  %v1601_v16 = vsel %vm343_vm3, %v1596_v27, 0 }
 0x576   :  { %2853 = vmatprep.subr.bf16.mxu0 %v3268_v3  ;;  %v1364_v22 = vpack.c.bf16 %v1363_v19, %v1363_v19 }
 0x578   :  { %v1711_v52 = vpop.permute.xlu1 %1710 }
 0x579   :  { %v1716_v34 = vsel %vm343_vm3, %v1711_v52, 0 }
 0x57c   :  { %2844 = vmatmul.mubr.msk.bf16.vlgmr.msra.gmra.mrb[36].mxu0 %vm279_vm2, %v1253_v11  ;;  %v1476_v17 = vpop.xlane.xlu0 %1475  ;;  %v1937_v61 = vpop.permute.xlu1 %1936 }
 0x57d   :  { %2854 = vmatpush3.bf16.msra.mxu0 %v1371_v15  ;;  %3064 = vrcp.f32 %v1476_v17  ;;  %2855 = vmatprep.mubr.msk.bf16.mxu0 %vm3269_vm1, %v3268_v3  ;;  %v1942_v42 = vsel %vm343_vm3, %v1937_v61, 0 }
 0x57e   :  { %2865 = vmatprep.subr.bf16.mxu0 %v3268_v3 }
 0x580   :  { %v1591_v53 = vpop.xlane.xlu0 %1590  ;;  %v2052_v46 = vpop.permute.xlu1 %2051 }
 0x581   :  { %3066 = vrcp.f32 %v1591_v53  ;;  %v2057_v50 = vsel %vm343_vm3, %v2052_v46, 0 }
 0x584   :  { %2856 = vmatmul.mubr.msk.bf16.vlgmr.msra.gmra.mrb[40].mxu0 %vm279_vm2, %v1364_v22  ;;  %v1706_v10 = vpop.xlane.xlu0 %1705 }
 0x585   :  { %2866 = vmatpush3.bf16.msra.mxu0 %v1486_v23  ;;  %2867 = vmatprep.mubr.msk.bf16.mxu0 %vm3269_vm1, %v3268_v3  ;;  %3068 = vrcp.f32 %v1706_v10 }
 0x586   :  { %2877 = vmatprep.subr.bf16.mxu0 %v3268_v3 }
 0x587   :  { %v3065_v45 = vpop.eup %3064 }
 0x588   :  { %v1478_v33 = vmul.f32 %v3065_v45, %v3761_v54  ;;  %v1817_v26 = vpop.xlane.xlu0 %1816 }
 0x589   :  { %3070 = vrcp.f32 %v1817_v26 }
 0x58a   :  { %v1479_v28 = vpack.c.bf16 %v1478_v33, %v1478_v33 }
 0x58b   :  { %v3067_v35 = vpop.eup %3066 }
 0x58c   :  { %2868 = vmatmul.mubr.msk.bf16.vlgmr.msra.gmra.mrb[44].mxu0 %vm279_vm2, %v1479_v28  ;;  %v1932_v40 = vpop.xlane.xlu0 %1931  ;;  %v1593_v47 = vmul.f32 %v3067_v35, %v3766_v57 }
 0x58d   :  { %2878 = vmatpush3.bf16.msra.mxu0 %v1601_v16  ;;  %2879 = vmatprep.mubr.msk.bf16.mxu0 %vm3269_vm1, %v3268_v3  ;;  %3072 = vrcp.f32 %v1932_v40 }
 0x58e   :  { %2889 = vmatprep.subr.bf16.mxu0 %v3268_v3  ;;  %v1594_v54 = vpack.c.bf16 %v1593_v47, %v1593_v47 }
 0x58f   :  { %v3069_v12 = vpop.eup %3068 }
 0x590   :  { %v2047_v32 = vpop.xlane.xlu0 %2046  ;;  %v1708_v56 = vmul.f32 %v3069_v12, %v3771_v60 }
 0x591   :  { %3074 = vrcp.f32 %v2047_v32 }
 0x592   :  { %v1709_v36 = vpack.c.bf16 %v1708_v56, %v1708_v56 }
 0x593   :  { %v3071_v37 = vpop.eup %3070 }
 0x594   :  { %2880 = vmatmul.mubr.msk.bf16.vlgmr.msra.gmra.mrb[48].mxu0 %vm279_vm2, %v1594_v54  ;;  %v1822_v57 = vpop.permute.xlu0 %1821  ;;  %v1819_v38 = vmul.f32 %v3071_v37, %v3775_v18 }
 0x595   :  { %2890 = vmatpush3.bf16.msra.mxu0 %v1716_v34  ;;  %2891 = vmatprep.mubr.msk.bf16.mxu0 %vm3269_vm1, %v3268_v3  ;;  %v1827_v14 = vsel %vm343_vm3, %v1822_v57, 0 }
 0x596   :  { %2901 = vmatprep.subr.bf16.mxu0 %v3268_v3  ;;  %v1820_v60 = vpack.c.bf16 %v1819_v38, %v1819_v38 }
 0x597   :  { %v3073_v39 = vpop.eup %3072 }
 0x598   :  { %v1934_v43 = vmul.f32 %v3073_v39, %v3779_v2 }
 0x59a   :  { %v1935_v18 = vpack.c.bf16 %v1934_v43, %v1934_v43 }
 0x59b   :  { %v3075_v48 = vpop.eup %3074 }
 0x59c   :  { %2892 = vmatmul.mubr.msk.bf16.vlgmr.msra.gmra.mrb[52].mxu0 %vm279_vm2, %v1709_v36  ;;  %v2049_v51 = vmul.f32 %v3075_v48, %v3783_v7 }
 0x59d   :  { %2902 = vmatpush3.bf16.msra.mxu0 %v1827_v14  ;;  %2903 = vmatprep.mubr.msk.bf16.mxu0 %vm3269_vm1, %v3268_v3 }
 0x59e   :  { %2913 = vmatprep.subr.bf16.mxu0 %v3268_v3  ;;  %v2050_v5 = vpack.c.bf16 %v2049_v51, %v2049_v51  ;;  %v2995_v51 = vld [vmem:[#allocation6 + $0x8] sm:$0xff]  }
 0x5a4   :  { %2904 = vmatmul.mubr.msk.bf16.vlgmr.msra.gmra.mrb[56].mxu0 %vm279_vm2, %v1820_v60 }
 0x5a5   :  { %2914 = vmatpush3.bf16.msra.mxu0 %v1942_v42  ;;  %2915 = vmatprep.mubr.msk.bf16.mxu0 %vm3269_vm1, %v3268_v3 }
 0x5a6   :  { %2925 = vmatprep.subr.bf16.mxu0 %v3268_v3 }
 0x5ac   :  { %2916 = vmatmul.mubr.msk.bf16.vlgmr.msra.gmra.mrb[60].mxu0 %vm279_vm2, %v1935_v18 }
 0x5ad   :  { %2926 = vmatpush3.bf16.msra.mxu0 %v2057_v50  ;;  %2927 = vmatprep.mubr.msk.bf16.mxu0 %vm3269_vm1, %v3268_v3  ;;  %v2994_v50 = vld [vmem:[#allocation6] sm:$0xff]  }
 0x5ae   :  { %2931 = vmatprep.subr.bf16.mxu1 %v2994_v50 }
 0x5af   :  { %2932 = vmatpush3.bf16.msra.mxu1 %v2994_v50 }
 0x5b0   :  { %2933 = vmatprep.subr.bf16.mxu1 %v2995_v51 }
 0x5b3   :  { %2934 = vmatpush3.bf16.msra.mxu1 %v2995_v51 }
 0x5b4   :  { %2928 = vmatmul.mubr.msk.bf16.vlgmr.msra.gmra.mrb[64].mxu0 %vm279_vm2, %v2050_v5 }
 0x5ea   :  { %v381_v0 = vpop.f32.mrb[4].mxu0 }
 0x5eb   :  { %387 = vst.msk [vmem:[#allocation2] sm:$0xff] %vm279_vm2, %v381_v0  ;;  %v2749_v2 = vpop.f32.mrb[5].mxu0 }
 0x5ec   :  { %v384_v58 = vpop.f32.mrb[6].mxu0 }
 0x5ed   :  { %v2750_v6 = vpop.f32.mrb[7].mxu0 }
 0x5f2   :  { %v492_v25 = vpop.f32.mrb[8].mxu0 }
 0x5f3   :  { %499 = vrot.lane.b32.xlu1 %v492_v25, %s3280_s18  ;;  %v2761_v55 = vpop.f32.mrb[9].mxu0 }
 0x5f4   :  { %v495_v62 = vpop.f32.mrb[10].mxu0 }
 0x5f5   :  { %v2762_v13 = vpop.f32.mrb[11].mxu0 }
 0x603   :  { %v608_v4 = vpop.f32.mrb[12].mxu0 }
 0x604   :  { %615 = vrot.lane.b32.xlu1 %v608_v4, %s3281_s23  ;;  %v2773_v3 = vpop.f32.mrb[13].mxu0 }
 0x605   :  { %v611_v7 = vpop.f32.mrb[14].mxu0 }
 0x606   :  { %v2774_v59 = vpop.f32.mrb[15].mxu0 }
 0x60b   :  { %v724_v9 = vpop.f32.mrb[16].mxu0 }
 0x60c   :  { %731 = vrot.lane.b32.xlu0 %v724_v9, %s3282_s15  ;;  %v2785_v63 = vpop.f32.mrb[17].mxu0 }
 0x60d   :  { %v727_v20 = vpop.f32.mrb[18].mxu0 }
 0x60e   :  { %v2786_v29 = vpop.f32.mrb[19].mxu0 }
 0x613   :  { %v840_v1 = vpop.f32.mrb[20].mxu0 }
 0x614   :  { %846 = vst.msk [vmem:[#allocation2 + $0x8] sm:$0xff] %vm279_vm2, %v840_v1  ;;  %v2797_v24 = vpop.f32.mrb[21].mxu0 }
 0x615   :  { %v843_v8 = vpop.f32.mrb[22].mxu0 }
 0x616   :  { %v2798_v31 = vpop.f32.mrb[23].mxu0 }
 0x61b   :  { %v951_v11 = vpop.f32.mrb[24].mxu0 }
 0x61c   :  { %958 = vrot.lane.b32.xlu1 %v951_v11, %s3280_s18  ;;  %v2809_v30 = vpop.f32.mrb[25].mxu0 }
 0x61d   :  { %v954_v15 = vpop.f32.mrb[26].mxu0 }
 0x61e   :  { %v2810_v17 = vpop.f32.mrb[27].mxu0 }
 0x63f   :  { %v1066_v19 = vpop.f32.mrb[28].mxu0 }
 0x640   :  { %1073 = vrot.lane.b32.xlu1 %v1066_v19, %s3281_s23  ;;  %v2821_v53 = vpop.f32.mrb[29].mxu0  ;;  %v2627_v19 = vld [vmem:[#allocation8] ss:$0 sm:$0xff] }
 0x641   :  { %v1069_v21 = vpop.f32.mrb[30].mxu0 }
 0x642   :  { %v2822_v22 = vpop.f32.mrb[31].mxu0  ;;  %v3092_v21 = vld [vmem:[%s3995_s0 + $0x10] sm:$0xff] }
 0x647   :  { %v1181_v23 = vpop.f32.mrb[32].mxu0 }
 0x648   :  { %1188 = vrot.lane.b32.xlu1 %v1181_v23, %s3282_s15  ;;  %v2833_v10 = vpop.f32.mrb[33].mxu0  ;;  %v3093_v23 = vld [vmem:[%s3995_s0] sm:$0xff] }
 0x649   :  { %v1184_v45 = vpop.f32.mrb[34].mxu0 }
 0x64a   :  { %v2834_v33 = vpop.f32.mrb[35].mxu0 }
 0x64f   :  { %v1296_v26 = vpop.f32.mrb[36].mxu0 }
 0x650   :  { %1302 = vst.msk [vmem:[#allocation2 + $0x10] sm:$0xff] %vm279_vm2, %v1296_v26  ;;  %v2845_v27 = vpop.f32.mrb[37].mxu0 }
 0x651   :  { %v1299_v28 = vpop.f32.mrb[38].mxu0  ;;  %v3094_v27 = vld [vmem:[%s3995_s0 + $0x8] sm:$0xff] }
 0x652   :  { %v2846_v35 = vpop.f32.mrb[39].mxu0 }
 0x657   :  { %v1407_v16 = vpop.f32.mrb[40].mxu0 }
 0x658   :  { %1414 = vrot.lane.b32.xlu0 %v1407_v16, %s3280_s18  ;;  %v2857_v40 = vpop.f32.mrb[41].mxu0  ;;  %v3095_v16 = vld [vmem:[%s3995_s0 + $0x18] sm:$0xff] }
 0x659   :  { %v1410_v47 = vpop.f32.mrb[42].mxu0 }
 0x65a   :  { %v2858_v52 = vpop.f32.mrb[43].mxu0 }
 0x65f   :  { %v1522_v54 = vpop.f32.mrb[44].mxu0 }
 0x660   :  { %1529 = vrot.lane.b32.xlu0 %v1522_v54, %s3281_s23  ;;  %v2869_v12 = vpop.f32.mrb[45].mxu0 }
 0x661   :  { %v1525_v32 = vpop.f32.mrb[46].mxu0 }
 0x662   :  { %v2870_v34 = vpop.f32.mrb[47].mxu0 }
 0x665   :  { %v500_v56 = vpop.permute.xlu1 %499 }
 0x666   :  { %503 = vst.msk [vmem:[#allocation2] sm:$0xff] %vm502_vm4, %v500_v56 }
 0x667   :  { %v1637_v57 = vpop.f32.mrb[48].mxu0 }
 0x668   :  { %1644 = vrot.lane.b32.xlu0 %v1637_v57, %s3282_s15  ;;  %v2881_v36 = vpop.f32.mrb[49].mxu0 }
 0x669   :  { %v1640_v37 = vpop.f32.mrb[50].mxu0 }
 0x66a   :  { %v2882_v14 = vpop.f32.mrb[51].mxu0 }
 0x66f   :  { %v1752_v38 = vpop.f32.mrb[52].mxu0 }
 0x670   :  { %1758 = vst.msk [vmem:[#allocation2 + $0x18] sm:$0xff] %vm279_vm2, %v1752_v38  ;;  %v2893_v61 = vpop.f32.mrb[53].mxu0 }
 0x671   :  { %v1755_v60 = vpop.f32.mrb[54].mxu0 }
 0x672   :  { %v2894_v39 = vpop.f32.mrb[55].mxu0 }
 0x676   :  { %v616_v42 = vpop.permute.xlu1 %615 }
 0x677   :  { %619 = vst.msk [vmem:[#allocation2] sm:$0xff] %vm618_vm5, %v616_v42  ;;  %v1863_v43 = vpop.f32.mrb[56].mxu0 }
 0x678   :  { %1870 = vrot.lane.b32.xlu1 %v1863_v43, %s3280_s18  ;;  %v2905_v46 = vpop.f32.mrb[57].mxu0 }
 0x679   :  { %v1866_v18 = vpop.f32.mrb[58].mxu0 }
 0x67a   :  { %v2906_v48 = vpop.f32.mrb[59].mxu0 }
 0x67e   :  { %v732_v5 = vpop.permute.xlu0 %731 }
 0x67f   :  { %735 = vst.msk [vmem:[#allocation2] sm:$0xff] %vm734_vm6, %v732_v5  ;;  %v1978_v0 = vpop.f32.mrb[60].mxu0 }
 0x680   :  { %1985 = vrot.lane.b32.xlu1 %v1978_v0, %s3281_s23  ;;  %v2917_v2 = vpop.f32.mrb[61].mxu0  ;;  %s3228_s23 = scalar_lea.vmem %s2572_s26, 512 }
 0x681   :  { %v1981_v58 = vpop.f32.mrb[62].mxu0  ;;  %p3229_p6 = scmp.ne.s32.totalorder %s2572_s26, %s3228_s23  ;;  %p3234_p8 = scmp.lt.s32.totalorder %s3228_s23, %s3228_s23 }
 0x682   :  { %v2918_v6 = vpop.f32.mrb[63].mxu0 }
 0x683   :  { %v2996_v6 = vld [vmem:[#allocation11] sm:$0xff]   ;;  %p3235_p9 = por %p3234_p8, %p3233_p7 }
 0x684   :  { %2939 = vmatprep.subr.bf16.mxu0 %v2996_v6 }
 0x685   :  { %2940 = vmatpush3.bf16.msra.mxu0 %v2996_v6  ;;  %p3236_p10 = pnand %p3235_p9, %p3229_p6 }
 0x686   :  { %v2104_v59 = vld [vmem:[#allocation2] sm:$0xff] }
 0x687   :  { %v2093_v25 = vpop.f32.mrb[64].mxu0 }
 0x688   :  { %2100 = vrot.lane.b32.xlu1 %v2093_v25, %s3282_s15  ;;  %v2929_v55 = vpop.f32.mrb[65].mxu0  ;;  %v2997_v25 = vld [vmem:[#allocation11 + $0x8] sm:$0xff]  }
 0x689   :  { %v2096_v62 = vpop.f32.mrb[66].mxu0  ;;  %2941 = vmatprep.subr.bf16.mxu0 %v2997_v25 }
 0x68a   :  { %v2930_v13 = vpop.f32.mrb[67].mxu0  ;;  %2942 = vmatpush3.bf16.msra.mxu0 %v2997_v25 }
 0x68e   :  { %v959_v4 = vpop.permute.xlu1 %958 }
 0x68f   :  { %961 = vst.msk [vmem:[#allocation2 + $0x8] sm:$0xff] %vm502_vm4, %v959_v4 }
 0x6b2   :  { %v1074_v3 = vpop.permute.xlu1 %1073 }
 0x6b3   :  { %1076 = vst.msk [vmem:[#allocation2 + $0x8] sm:$0xff] %vm618_vm5, %v1074_v3 }
 0x6ba   :  { %v1189_v7 = vpop.permute.xlu1 %1188 }
 0x6bb   :  { %1191 = vst.msk [vmem:[#allocation2 + $0x8] sm:$0xff] %vm734_vm6, %v1189_v7 }
 0x6c2   :  { %v2105_v9 = vld [vmem:[#allocation2 + $0x8] sm:$0xff] }
 0x6c3   :  { %v2108_v63 = vpack.c.bf16 %v2105_v9, %v2104_v59 }
 0x6c5   :  { %2935 = vmatprep.mubr.msk.bf16.mxu1 %vm125_vm0, %v2108_v63 }
 0x6ca   :  { %v1415_v20 = vpop.permute.xlu0 %1414 }
 0x6cb   :  { %1417 = vst.msk [vmem:[#allocation2 + $0x10] sm:$0xff] %vm502_vm4, %v1415_v20 }
 0x6d2   :  { %v1530_v29 = vpop.permute.xlu0 %1529 }
 0x6d3   :  { %1532 = vst.msk [vmem:[#allocation2 + $0x10] sm:$0xff] %vm618_vm5, %v1530_v29 }
 0x6da   :  { %v1645_v1 = vpop.permute.xlu0 %1644 }
 0x6db   :  { %1647 = vst.msk [vmem:[#allocation2 + $0x10] sm:$0xff] %vm734_vm6, %v1645_v1  ;;  %v2196_v1 = vld [vmem:[#allocation9] sm:$0x3] }
 0x6e2   :  { %v2106_v11 = vld [vmem:[#allocation2 + $0x10] sm:$0xff] }
 0x6ea   :  { %v1871_v24 = vpop.permute.xlu1 %1870 }
 0x6eb   :  { %1873 = vst.msk [vmem:[#allocation2 + $0x18] sm:$0xff] %vm502_vm4, %v1871_v24 }
 0x6f2   :  { %v1986_v8 = vpop.permute.xlu1 %1985 }
 0x6f3   :  { %1988 = vst.msk [vmem:[#allocation2 + $0x18] sm:$0xff] %vm618_vm5, %v1986_v8  ;;  %v2252_v8 = vrot.slane %v2196_v1, %v181_v44 }
 0x6fa   :  { %v2101_v31 = vpop.permute.xlu1 %2100 }
 0x6fb   :  { %2103 = vst.msk [vmem:[#allocation2 + $0x18] sm:$0xff] %vm734_vm6, %v2101_v31 }
 0x702   :  { %v2107_v30 = vld [vmem:[#allocation2 + $0x18] sm:$0xff] }
 0x703   :  { %v2109_v15 = vpack.c.bf16 %v2107_v30, %v2106_v11  ;;  %v2260_v11 = vrot.slane %v2196_v1, %v189_v49  ;;  %v2998_v49 = vld [vmem:[%s4004_s9] sm:$0xff]  }
 0x704   :  { %2947 = vmatprep.subr.bf16.mxu1 %v2998_v49 }
 0x705   :  { %2936 = vmatmul.mubr.msk.bf16.vlgmr.msra.gmra.mrb[64].mxu1 %vm125_vm0, %v2109_v15 }
 0x706   :  { %2948 = vmatpush3.bf16.msra.mxu1 %v2998_v49 }
 0x7d8   :  { %v2937_v17 = vpop.f32.mrb[64].mxu1 }
 0x7d9   :  { %v2166_v53 = vpop.f32.mrb[65].mxu1  ;;  %v2183_v22 = vadd.f32 %v3092_v21, %v2937_v17 }
 0x7da   :  { %v2181_v10 = vadd.f32 %v3093_v23, %v2166_v53  ;;  %v2938_v45 = vpop.f32.mrb[66].mxu1 }
 0x7db   :  { %v2169_v33 = vpop.f32.mrb[67].mxu1  ;;  %v3921_v35 = vadd.f32 %v2627_v19, %v2183_v22  ;;  %v2184_v40 = vadd.f32 %v3095_v16, %v2938_v45 }
 0x7dc   :  { %v3916_v26 = vadd.f32 %v2627_v19, %v2181_v10  ;;  %v2182_v28 = vadd.f32 %v3094_v27, %v2169_v33 }
 0x7dd   :  { %v3932_v12 = vadd.f32 %v2627_v19, %v2184_v40  ;;  %v2203_v32 = vsel %vm125_vm0, %v3921_v35, 0.0 }
 0x7de   :  { %v3926_v47 = vadd.f32 %v2627_v19, %v2182_v28  ;;  %v2197_v52 = vsel %vm125_vm0, %v3916_v26, 0.0 }
 0x7df   :  { %2198 = vadd.xlane.f32.xlu0 %v2197_v52  ;;  %v2206_v34 = vsel %vm125_vm0, %v3932_v12, 0.0  ;;  %v2999_v52 = vld [vmem:[%s4004_s9 + $0x8] sm:$0xff]  }
 0x7e0   :  { %v2200_v54 = vsel %vm125_vm0, %v3926_v47, 0.0  ;;  %2949 = vmatprep.subr.bf16.mxu1 %v2999_v52 }
 0x7e1   :  { %2201 = vadd.xlane.f32.xlu1 %v2200_v54  ;;  %2950 = vmatpush3.bf16.msra.mxu1 %v2999_v52  ;;  %v3000_v54 = vld [vmem:[%s4004_s9 + $0x10] sm:$0xff]  }
 0x7e2   :  { %2951 = vmatprep.subr.bf16.mxu1 %v3000_v54 }
 0x7e3   :  { %2204 = vadd.xlane.f32.xlu0 %v2203_v32  ;;  %v3001_v32 = vld [vmem:[%s4004_s9 + $0x18] sm:$0xff]  }
 0x7e5   :  { %2952 = vmatpush3.bf16.msra.mxu1 %v3000_v54 }
 0x7e6   :  { %2953 = vmatprep.subr.bf16.mxu1 %v3001_v32 }
 0x7e7   :  { %2207 = vadd.xlane.f32.xlu0 %v2206_v34  ;;  %v2628_v34 = vld [vmem:[#allocation12] ss:$0 sm:$0xff] }
 0x7e9   :  { %2954 = vmatpush3.bf16.msra.mxu1 %v3001_v32 }
 0x86c   :  { %v2199_v56 = vpop.xlane.xlu0 %2198 }
 0x86d   :  { %v2209_v57 = vmul.f32 0.03125, %v2199_v56 }
 0x86e   :  { %v2202_v36 = vpop.xlane.xlu1 %2201 }
 0x86f   :  { %v2213_v37 = vsub.f32 %v3916_v26, %v2209_v57  ;;  %v2210_v14 = vmul.f32 0.03125, %v2202_v36 }
 0x870   :  { %v2205_v38 = vpop.xlane.xlu0 %2204 }
 0x871   :  { %v2214_v61 = vsub.f32 %v3926_v47, %v2210_v14  ;;  %v2211_v60 = vmul.f32 0.03125, %v2205_v38  ;;  %v2217_v39 = vmul.f32 %v2213_v37, %v2213_v37 }
 0x873   :  { %v2215_v42 = vsub.f32 %v3921_v35, %v2211_v60  ;;  %v2221_v43 = vsel %vm125_vm0, %v2217_v39, 0.0  ;;  %v2218_v46 = vmul.f32 %v2214_v61, %v2214_v61 }
 0x874   :  { %2222 = vadd.xlane.f32.xlu0 %v2221_v43  ;;  %v2208_v18 = vpop.xlane.xlu0 %2207 }
 0x875   :  { %v2212_v48 = vmul.f32 0.03125, %v2208_v18  ;;  %v2224_v50 = vsel %vm125_vm0, %v2218_v46, 0.0  ;;  %v2219_v51 = vmul.f32 %v2215_v42, %v2215_v42 }
 0x876   :  { %2225 = vadd.xlane.f32.xlu1 %v2224_v50 }
 0x877   :  { %v2216_v5 = vsub.f32 %v3932_v12, %v2212_v48  ;;  %v2227_v0 = vsel %vm125_vm0, %v2219_v51, 0.0 }
 0x878   :  { %2228 = vadd.xlane.f32.xlu0 %v2227_v0 }
 0x879   :  { %v2220_v2 = vmul.f32 %v2216_v5, %v2216_v5 }
 0x87b   :  { %v2230_v58 = vsel %vm125_vm0, %v2220_v2, 0.0 }
 0x87c   :  { %2231 = vadd.xlane.f32.xlu1 %v2230_v58 }
 0x901   :  { %v2223_v55 = vpop.xlane.xlu0 %2222 }
 0x902   :  { %v2233_v62 = vmul.f32 0.03125, %v2223_v55 }
 0x903   :  { %v2226_v13 = vpop.xlane.xlu1 %2225 }
 0x904   :  { %v2237_v4 = vadd.f32 1e-05, %v2233_v62  ;;  %v2234_v3 = vmul.f32 0.03125, %v2226_v13 }
 0x905   :  { %v2229_v7 = vpop.xlane.xlu0 %2228 }
 0x906   :  { %3076 = vrsqrt.f32 %v2237_v4  ;;  %v2238_v59 = vadd.f32 1e-05, %v2234_v3  ;;  %v2235_v9 = vmul.f32 0.03125, %v2229_v7 }
 0x908   :  { %3078 = vrsqrt.f32 %v2238_v59  ;;  %v2239_v63 = vadd.f32 1e-05, %v2235_v9 }
 0x909   :  { %v2232_v20 = vpop.xlane.xlu1 %2231 }
 0x90a   :  { %3080 = vrsqrt.f32 %v2239_v63  ;;  %v2236_v29 = vmul.f32 0.03125, %v2232_v20 }
 0x90c   :  { %v2240_v24 = vadd.f32 1e-05, %v2236_v29 }
 0x90e   :  { %3082 = vrsqrt.f32 %v2240_v24 }
 0x910   :  { %v3077_v31 = vpop.eup %3076 }
 0x911   :  { %v2245_v30 = vmul.f32 %v3077_v31, %v2213_v37 }
 0x912   :  { %v3079_v15 = vpop.eup %3078 }
 0x913   :  { %v2246_v17 = vmul.f32 %v3079_v15, %v2214_v61  ;;  %v2253_v19 = vmul.f32 %v2252_v8, %v2245_v30 }
 0x914   :  { %v3081_v53 = vpop.eup %3080 }
 0x915   :  { %v2247_v21 = vmul.f32 %v3081_v53, %v2215_v42  ;;  %v2254_v22 = vmul.f32 %v2252_v8, %v2246_v17  ;;  %v2261_v23 = vadd.f32 %v2260_v11, %v2253_v19 }
 0x917   :  { %v2255_v10 = vmul.f32 %v2252_v8, %v2247_v21  ;;  %v2262_v45 = vadd.f32 %v2260_v11, %v2254_v22 }
 0x918   :  { %v3083_v33 = vpop.eup %3082 }
 0x919   :  { %v2248_v27 = vmul.f32 %v3083_v33, %v2216_v5  ;;  %v2265_v28 = vpack.c.bf16 %v2262_v45, %v2261_v23  ;;  %v2263_v16 = vadd.f32 %v2260_v11, %v2255_v10  ;;  %v3002_v10 = vld [vmem:[%s4006_s11] sm:$0xff]   ;;  %v3003_v45 = vld [vmem:[%s4006_s11 + $0x8] sm:$0xff]  }
 0x91a   :  { %2959 = vmatprep.subr.bf16.mxu0 %v3002_v10  ;;  %v2633_v33 = vld [vmem:[%s4005_s10] ss:$0 sm:$0xff] }
 0x91b   :  { %v2256_v40 = vmul.f32 %v2252_v8, %v2248_v27  ;;  %2943 = vmatprep.mubr.msk.bf16.mxu0 %vm125_vm0, %v2265_v28 }
 0x91d   :  { %v2264_v44 = vadd.f32 %v2260_v11, %v2256_v40 }
 0x91f   :  { %v2266_v41 = vpack.c.bf16 %v2264_v44, %v2263_v16 }
 0x921   :  { %2944 = vmatmul.mubr.msk.bf16.vlgmr.msra.gmra.mrb[68].mxu0 %vm125_vm0, %v2266_v41 }
 0x922   :  { %2960 = vmatpush3.bf16.msra.mxu0 %v3002_v10 }
 0x923   :  { %2961 = vmatprep.subr.bf16.mxu0 %v3003_v45 }
 0x926   :  { %2962 = vmatpush3.bf16.msra.mxu0 %v3003_v45 }
 0x9f4   :  { %v2945_v56 = vpop.f32.mrb[68].mxu0 }
 0x9f5   :  { %v2339_v57 = vadd.f32 %v2945_v56, %v2628_v34  ;;  %v2330_v36 = vpop.f32.mrb[69].mxu0 }
 0x9f6   :  { %v2331_v37 = vadd.f32 %v2628_v34, %v2330_v36  ;;  %v2946_v14 = vpop.f32.mrb[70].mxu0 }
 0x9f7   :  { %v2347_v38 = vmul.f32 %v2339_v57, %v2339_v57  ;;  %v2342_v61 = vadd.f32 %v2946_v14, %v2628_v34  ;;  %v2333_v60 = vpop.f32.mrb[71].mxu0 }
 0x9f8   :  { %v2345_v39 = vmul.f32 %v2331_v37, %v2331_v37  ;;  %v2334_v42 = vadd.f32 %v2628_v34, %v2333_v60 }
 0x9f9   :  { %v2351_v43 = vmul.f32 %v2347_v38, %v2339_v57  ;;  %v2348_v46 = vmul.f32 %v2342_v61, %v2342_v61 }
 0x9fa   :  { %v2349_v18 = vmul.f32 %v2345_v39, %v2331_v37  ;;  %v2346_v48 = vmul.f32 %v2334_v42, %v2334_v42 }
 0x9fb   :  { %v2355_v50 = vmul.f32 0.044715, %v2351_v43  ;;  %v2352_v51 = vmul.f32 %v2348_v46, %v2342_v61 }
 0x9fc   :  { %v2353_v5 = vmul.f32 0.044715, %v2349_v18  ;;  %v2350_v0 = vmul.f32 %v2346_v48, %v2334_v42 }
 0x9fd   :  { %v2359_v2 = vadd.f32 %v2355_v50, %v2339_v57  ;;  %v2356_v58 = vmul.f32 0.044715, %v2352_v51 }
 0x9fe   :  { %v2357_v6 = vadd.f32 %v2353_v5, %v2331_v37  ;;  %v2354_v25 = vmul.f32 0.044715, %v2350_v0 }
 0x9ff   :  { %v2363_v55 = vmul.f32 0.7978846, %v2359_v2  ;;  %v2360_v62 = vadd.f32 %v2356_v58, %v2342_v61 }
 0xa00   :  { %v2361_v13 = vmul.f32 0.7978846, %v2357_v6  ;;  %v2358_v4 = vadd.f32 %v2354_v25, %v2334_v42 }
 0xa01   :  { %3084 = vtanh.f32 %v2363_v55  ;;  %v2364_v3 = vmul.f32 0.7978846, %v2360_v62 }
 0xa02   :  { %3086 = vtanh.f32 %v2361_v13  ;;  %v2362_v7 = vmul.f32 0.7978846, %v2358_v4 }
 0xa03   :  { %3088 = vtanh.f32 %v2364_v3 }
 0xa04   :  { %3090 = vtanh.f32 %v2362_v7 }
 0xa0b   :  { %v3085_v59 = vpop.eup %3084 }
 0xa0c   :  { %v3087_v9 = vpop.eup %3086  ;;  %v2371_v63 = vadd.f32 1.0, %v3085_v59 }
 0xa0d   :  { %v3089_v20 = vpop.eup %3088  ;;  %v2369_v29 = vadd.f32 1.0, %v3087_v9 }
 0xa0e   :  { %v3091_v1 = vpop.eup %3090  ;;  %v2375_v24 = vmul.f32 0.5, %v2371_v63  ;;  %v2372_v8 = vadd.f32 1.0, %v3089_v20 }
 0xa0f   :  { %v2373_v31 = vmul.f32 0.5, %v2369_v29  ;;  %v2370_v11 = vadd.f32 1.0, %v3091_v1 }
 0xa10   :  { %v2376_v30 = vmul.f32 0.5, %v2372_v8  ;;  %v2379_v17 = vmul.f32 %v2375_v24, %v2339_v57 }
 0xa11   :  { %v2374_v15 = vmul.f32 0.5, %v2370_v11  ;;  %v2377_v53 = vmul.f32 %v2373_v31, %v2331_v37  ;;  %v2640_v37 = vld [vmem:[%s4007_s12] ss:$0 sm:$0xff] }
 0xa12   :  { %v2380_v19 = vmul.f32 %v2376_v30, %v2342_v61 }
 0xa13   :  { %v2378_v21 = vmul.f32 %v2374_v15, %v2334_v42 }
 0xa14   :  { %v2382_v22 = vpack.c.bf16 %v2380_v19, %v2379_v17 }
 0xa15   :  { %v2381_v23 = vpack.c.bf16 %v2378_v21, %v2377_v53 }
 0xa17   :  { %2955 = vmatprep.mubr.msk.bf16.mxu1 %vm2422_vm7, %v2381_v23 }
 0xa18   :  { %2956 = vmatmul.mubr.msk.bf16.vlgmr.msra.gmra.mrb[68].mxu1 %vm2422_vm7, %v2382_v22 }
 0xaeb   :  { %v2957_v27 = vpop.f32.mrb[68].mxu1 }
 0xaec   :  { %v2472_v28 = vadd.f32 %v2957_v27, %v2633_v33  ;;  %v2463_v16 = vpop.f32.mrb[69].mxu1 }
 0xaed   :  { %v2464_v40 = vadd.f32 %v2633_v33, %v2463_v16  ;;  %v2958_v44 = vpop.f32.mrb[70].mxu1 }
 0xaee   :  { %v2475_v41 = vadd.f32 %v2958_v44, %v2633_v33  ;;  %v2466_v49 = vpop.f32.mrb[71].mxu1  ;;  %v2480_v54 = vadd.f32 %v2472_v28, %v3921_v35 }
 0xaef   :  { %v2467_v52 = vadd.f32 %v2633_v33, %v2466_v49  ;;  %v2478_v34 = vadd.f32 %v2464_v40, %v3916_v26 }
 0xaf0   :  { %v2481_v32 = vadd.f32 %v2475_v41, %v3932_v12 }
 0xaf1   :  { %v2479_v56 = vadd.f32 %v2467_v52, %v3926_v47 }
 0xaf2   :  { %v2483_v57 = vpack.c.bf16 %v2481_v32, %v2480_v54 }
 0xaf3   :  { %v2482_v36 = vpack.c.bf16 %v2479_v56, %v2478_v34 }
 0xaf5   :  { %2963 = vmatprep.mubr.msk.bf16.mxu0 %vm125_vm0, %v2482_v36 }
 0xaf6   :  { %2964 = vmatmul.mubr.msk.bf16.vlgmr.msra.gmra.mrb[72].mxu0 %vm125_vm0, %v2483_v57 }
 0xbc9   :  { %v2965_v14 = vpop.f32.mrb[72].mxu0 }
 0xbca   :  { %v2556_v38 = vadd.f32 %v2965_v14, %v2640_v37  ;;  %v2547_v61 = vpop.f32.mrb[73].mxu0 }
 0xbcb   :  { %v2548_v35 = vadd.f32 %v2640_v37, %v2547_v61  ;;  %v2966_v12 = vpop.f32.mrb[74].mxu0 }
 0xbcc   :  { %2564 = vst [vmem:[#allocation14 + $0x10] sm:$0xff] %v2556_v38  ;;  %v2559_v26 = vadd.f32 %v2966_v12, %v2640_v37  ;;  %v2550_v47 = vpop.f32.mrb[75].mxu0 }
 0xbcd   :  { %2562 = vst [vmem:[#allocation14] sm:$0xff] %v2548_v35  ;;  %v2551_v60 = vadd.f32 %v2640_v37, %v2550_v47 }
 0xbce   :  { %2565 = vst [vmem:[#allocation14 + $0x18] sm:$0xff] %v2559_v26 }
 0xbcf   :  { %2563 = vst [vmem:[#allocation14 + $0x8] sm:$0xff] %v2551_v60 }
 0xbd0   :  { %3239 = shalt.err (!%p3236_p10)
}
 0xbd1   :  { %s3240_s4 = scalar_lea.hbm %s4008_s13, 512 }
 0xbd2   :  { %p3241_p11 = scmp.ne.s32.totalorder %s4008_s13, %s3240_s4  ;;  %p3244_p12 = scmp.lt.u32.totalorder %s3240_s4, %s4008_s13 }
 0xbd4   :  { %p3246_p13 = pnand %p3244_p12, %p3241_p11 }
 0xbd6   :  { %3249 = shalt.err (!%p3246_p13)
}
 0xbd7   :  { %s3284_s5 = smov 128  }
 0xbd8   :  { %2577 = dma.vmem_to_hbm [thread:$0]  %s2572_s26, 512, %s4008_s13, [#allocation5], %s3284_s5, %s3284_s5, %s3280_s18  }
 0xbd9   :  { %3258 = dma.done.wait [#allocation5], 512  }
 0xbda   :  { %3259 = vsyncadd [#allocation5], 4294966784 }
 0xbdb   :  { %2581 = vsyncpa [#allocation4], 1 }
 0xbdc   :  { %2582 = vsyncpa [#allocation7], 1 }
 0xbdd   :  { %2583 = vsyncpa [#allocation10], 1 }
 0xbde   :  { %2584 = vsyncpa [#allocation13], 1 }
 0xbdf   :  { %2585 = vsyncpa [#allocation5], 1 }

</bundles_post_ra>
